<compile_context>
chip_gen: v7x
topology: tpu7x:2x2x1
jax: 0.10.0
libtpu: 0.0.40
codegen_flags: <defaults>
</compile_context>

<pallas_src>
import functools
import math

import jax
import jax.numpy as jnp
from jax import lax
from jax.experimental import pallas as pl
from jax.experimental.pallas import tpu as pltpu


# ----------------------------- in-kernel helpers -----------------------------

def _layer_norm(x, w, b, eps=1e-5):
    """f32 LayerNorm over the last dim; w/b are (1, dim) rows."""
    mean = jnp.mean(x, axis=-1, keepdims=True)
    xc = x - mean
    var = jnp.mean(xc * xc, axis=-1, keepdims=True)
    return xc * lax.rsqrt(var + eps) * w + b


def _mha_core(q, k, v, wo_t, bo, bblk, sq, skv, heads):
    """Multi-head attention given already-projected Q/K/V slabs.

    q: (bblk*sq, dim) f32 (score scale already folded into the Q weights)
    k, v: (bblk*skv, dim) f32
    wo_t: (dim, dim) bf16 output-projection weight (pre-transposed), bo: (1, dim) f32.
    No mask, no dropout (inference).
    """
    m, dim = q.shape
    d_k = dim // heads
    q3 = q.astype(jnp.bfloat16).reshape(bblk, sq, dim)
    k3 = k.astype(jnp.bfloat16).reshape(bblk, skv, dim)
    v3 = v.astype(jnp.bfloat16).reshape(bblk, skv, dim)

    ctx_heads = []
    for h in range(heads):                       # static unroll; heads is small
        sl = slice(h * d_k, (h + 1) * d_k)       # lane slice of projected acts
        # scores (f32 accumulation on the MXU)
        s = jnp.einsum("bqd,bkd->bqk", q3[:, :, sl], k3[:, :, sl],
                       preferred_element_type=jnp.float32)
        s = s - jnp.max(s, axis=-1, keepdims=True)
        p = jnp.exp(s)
        # divide -> EUP approx reciprocal (free bundle slot) * VPU multiply
        p = p * pl.reciprocal(jnp.sum(p, axis=-1, keepdims=True), approx=True)
        ctx_heads.append(
            jnp.einsum("bqk,bkd->bqd", p.astype(jnp.bfloat16), v3[:, :, sl],
                       preferred_element_type=jnp.float32))

    # concatenate heads along lanes, then ONE full-width output projection.
    ctx = jnp.concatenate(ctx_heads, axis=-1).reshape(m, dim)
    return jnp.dot(ctx.astype(jnp.bfloat16), wo_t,
                   preferred_element_type=jnp.float32) + bo


# --------------------------------- kernel ------------------------------------

def _decoder_layer_kernel(
        x_ref, enc_ref,
        ln1w_ref, ln1b_ref, ln2w_ref, ln2b_ref, ln3w_ref, ln3b_ref,
        wqkv1_ref, wo1_ref, bo1_ref,
        wq2_ref, wkv2_ref, wo2_ref, bo2_ref,
        w1_ref, b1_ref, w2_ref, b2_ref,
        o_ref, *, heads):
    bblk, seq, dim = x_ref.shape
    enc_seq = enc_ref.shape[1]
    m = bblk * seq

    # residual stream stays f32; flatten batch*seq so the matmul M dim is wide
    x = x_ref[...].astype(jnp.float32).reshape(m, dim)
    enc_bf = enc_ref[...].reshape(bblk * enc_seq, dim).astype(jnp.bfloat16)

    # --- sub-layer 1: self-attention + residual -------------------------------
    xn = _layer_norm(x, ln1w_ref[...], ln1b_ref[...]).astype(jnp.bfloat16)
    qkv = jnp.dot(xn, wqkv1_ref[...], preferred_element_type=jnp.float32)
    x = x + _mha_core(qkv[:, :dim], qkv[:, dim:2 * dim], qkv[:, 2 * dim:],
                      wo1_ref[...], bo1_ref[...], bblk, seq, seq, heads)

    # --- sub-layer 2: cross-attention over encoder output + residual ----------
    xn = _layer_norm(x, ln2w_ref[...], ln2b_ref[...]).astype(jnp.bfloat16)
    q2 = jnp.dot(xn, wq2_ref[...], preferred_element_type=jnp.float32)
    kv = jnp.dot(enc_bf, wkv2_ref[...], preferred_element_type=jnp.float32)
    x = x + _mha_core(q2, kv[:, :dim], kv[:, dim:],
                      wo2_ref[...], bo2_ref[...], bblk, seq, enc_seq, heads)

    # --- sub-layer 3: feed-forward (Linear -> ReLU -> Linear) + residual ------
    # TODO(synk): dropout layers are inference-mode identity (no RNG dropout).
    xn = _layer_norm(x, ln3w_ref[...], ln3b_ref[...]).astype(jnp.bfloat16)
    h = jnp.maximum(
        jnp.dot(xn, w1_ref[...], preferred_element_type=jnp.float32)
        + b1_ref[...], 0.0)
    x = x + jnp.dot(h.astype(jnp.bfloat16), w2_ref[...],
                    preferred_element_type=jnp.float32) + b2_ref[...]

    o_ref[...] = x.reshape(bblk, seq, dim).astype(o_ref.dtype)


# --------------------------------- wrapper -----------------------------------

def _pick_batch_block(batch, seq, target_rows=128):
    """Largest divisor of batch such that bblk*seq stays near the MXU M tile."""
    want = max(1, -(-target_rows // seq))
    best = 1
    for cand in range(1, batch + 1):
        if batch % cand == 0 and cand <= want:
            best = cand
    return best


def decoder_layer(x, x_encoder, params, *, heads):
    """x: (batch, seq, dim) f32; x_encoder: (batch, enc_seq, dim) f32."""
    batch, seq, dim = x.shape
    enc_seq = x_encoder.shape[1]
    hidden = params["ff_w1"].shape[0]
    assert dim % heads == 0, "dim must be divisible by heads"
    d_k = dim // heads
    scale = 1.0 / math.sqrt(d_k)

    bblk = _pick_batch_block(batch, seq)
    grid = (batch // bblk,)

    bf16, f32 = jnp.bfloat16, jnp.float32

    def row(v):                                  # 1-D param -> lane-dense (1, N)
        return v.reshape(1, -1).astype(f32)

    # Fused QKV / KV weights; score scale folded into the Q projection weights.
    wqkv1 = jnp.concatenate(
        [params["attn1_wq"] * scale, params["attn1_wk"], params["attn1_wv"]],
        axis=0)                                  # (3*dim, dim)
    wkv2 = jnp.concatenate(
        [params["attn2_wk"], params["attn2_wv"]], axis=0)   # (2*dim, dim)

    weights = [
        row(params["ln1_w"]), row(params["ln1_b"]),
        row(params["ln2_w"]), row(params["ln2_b"]),
        row(params["ln3_w"]), row(params["ln3_b"]),
        wqkv1.T.astype(bf16),                          # (dim, 3*dim)
        params["attn1_wo"].T.astype(bf16),             # (dim, dim)
        row(params["attn1_bo"]),
        (params["attn2_wq"] * scale).T.astype(bf16),   # (dim, dim)
        wkv2.T.astype(bf16),                           # (dim, 2*dim)
        params["attn2_wo"].T.astype(bf16),             # (dim, dim)
        row(params["attn2_bo"]),
        params["ff_w1"].T.astype(bf16),                # (dim, hidden)
        row(params["ff_b1"]),
        params["ff_w2"].T.astype(bf16),                # (hidden, dim)
        row(params["ff_b2"]),
    ]

    in_specs = [
        pl.BlockSpec((bblk, seq, dim), lambda b: (b, 0, 0)),
        pl.BlockSpec((bblk, enc_seq, dim), lambda b: (b, 0, 0)),
    ] + [pl.BlockSpec(w.shape, lambda b: (0, 0)) for w in weights]

    # advisory cost estimate (matmul flops + softmax exps + bandwidth)
    flops = 2 * batch * (
        seq * dim * 3 * dim                      # fused QKV (self)
        + 2 * heads * seq * seq * d_k            # self-attn scores + ctx
        + seq * dim * dim                        # self-attn out proj
        + seq * dim * dim                        # cross-attn Q
        + enc_seq * dim * 2 * dim                # cross-attn fused KV
        + 2 * heads * seq * enc_seq * d_k        # cross-attn scores + ctx
        + seq * dim * dim                        # cross-attn out proj
        + 2 * seq * dim * hidden                 # feed-forward
    )
    transcendentals = batch * heads * seq * (seq + enc_seq)
    w_bytes = sum(int(w.size) * w.dtype.itemsize for w in weights)
    bytes_accessed = 2 * x.size * 4 + x_encoder.size * 4 + w_bytes

    # VMEM budget: double-buffered activation blocks + resident weights + f32
    # intermediates, with headroom; clamped below v7x's 64 MiB physical VMEM.
    m, menc = bblk * seq, bblk * enc_seq
    blk_bytes = 4 * bblk * dim * (2 * seq + enc_seq)
    act_bytes = 4 * (m * (6 * dim + 3 * dim + hidden)
                     + menc * 3 * dim + heads * m * max(seq, enc_seq))
    vmem_limit = int(min(64 * 2**20,
                         max(32 * 2**20, 2 * (2 * blk_bytes + 2 * w_bytes
                                              + act_bytes))))

    kernel = functools.partial(_decoder_layer_kernel, heads=heads)
    return pl.pallas_call(
        kernel,
        out_shape=jax.ShapeDtypeStruct((batch, seq, dim), x.dtype),
        grid=grid,
        in_specs=in_specs,
        out_specs=pl.BlockSpec((bblk, seq, dim), lambda b: (b, 0, 0)),
        compiler_params=pltpu.CompilerParams(
            dimension_semantics=("parallel",),
            vmem_limit_bytes=vmem_limit),
        cost_estimate=pl.CostEstimate(flops=int(flops),
                                      transcendentals=int(transcendentals),
                                      bytes_accessed=int(bytes_accessed)),
    )(x, x_encoder, *weights)


# --------------------------- pure-JAX reference -------------------------------

def decoder_layer_reference(x, x_encoder, params, *, heads):
    def ln(v, w, b, eps=1e-5):
        m = jnp.mean(v, axis=-1, keepdims=True)
        var = jnp.mean((v - m) ** 2, axis=-1, keepdims=True)
        return (v - m) / jnp.sqrt(var + eps) * w + b

    def linear(v, w, b=None):
        y = jnp.einsum("bsi,oi->bso", v, w)
        return y if b is None else y + b

    def mha(q_in, kv_in, wq, wk, wv, wo, bo):
        b_, sq, d = q_in.shape
        skv = kv_in.shape[1]
        dk = d // heads
        q = linear(q_in, wq).reshape(b_, sq, heads, dk).transpose(0, 2, 1, 3)
        k = linear(kv_in, wk).reshape(b_, skv, heads, dk).transpose(0, 2, 1, 3)
        v = linear(kv_in, wv).reshape(b_, skv, heads, dk).transpose(0, 2, 1, 3)
        s = jnp.einsum("bhqd,bhkd->bhqk", q, k) / math.sqrt(dk)
        p = jax.nn.softmax(s, axis=-1)
        ctx = jnp.einsum("bhqk,bhkd->bhqd", p, v)
        ctx = ctx.transpose(0, 2, 1, 3).reshape(b_, sq, d)
        return linear(ctx, wo, bo)

    xn = ln(x, params["ln1_w"], params["ln1_b"])
    x = x + mha(xn, xn, params["attn1_wq"], params["attn1_wk"],
                params["attn1_wv"], params["attn1_wo"], params["attn1_bo"])
    xn = ln(x, params["ln2_w"], params["ln2_b"])
    x = x + mha(xn, x_encoder, params["attn2_wq"], params["attn2_wk"],
                params["attn2_wv"], params["attn2_wo"], params["attn2_bo"])
    xn = ln(x, params["ln3_w"], params["ln3_b"])
    h = jax.nn.relu(linear(xn, params["ff_w1"], params["ff_b1"]))
    x = x + linear(h, params["ff_w2"], params["ff_b2"])
    return x


# ----------------------------------- main -------------------------------------

if __name__ == "__main__":
    batch, seq, enc_seq = 2, 8, 12
    dim, heads, hidden = 32, 4, 64

    ks = jax.random.split(jax.random.PRNGKey(0), 22)

    def normal(k, shape, scale=1.0):
        return scale * jax.random.normal(k, shape, dtype=jnp.float32)

    s_w = 1.0 / math.sqrt(dim)
    params = {
        "ln1_w": 1.0 + 0.1 * normal(ks[0], (dim,)),
        "ln1_b": 0.1 * normal(ks[1], (dim,)),
        "ln2_w": 1.0 + 0.1 * normal(ks[2], (dim,)),
        "ln2_b": 0.1 * normal(ks[3], (dim,)),
        "ln3_w": 1.0 + 0.1 * normal(ks[4], (dim,)),
        "ln3_b": 0.1 * normal(ks[5], (dim,)),
        "attn1_wq": normal(ks[6], (dim, dim), s_w),
        "attn1_wk": normal(ks[7], (dim, dim), s_w),
        "attn1_wv": normal(ks[8], (dim, dim), s_w),
        "attn1_wo": normal(ks[9], (dim, dim), s_w),
        "attn1_bo": 0.1 * normal(ks[10], (dim,)),
        "attn2_wq": normal(ks[11], (dim, dim), s_w),
        "attn2_wk": normal(ks[12], (dim, dim), s_w),
        "attn2_wv": normal(ks[13], (dim, dim), s_w),
        "attn2_wo": normal(ks[14], (dim, dim), s_w),
        "attn2_bo": 0.1 * normal(ks[15], (dim,)),
        "ff_w1": normal(ks[16], (hidden, dim), s_w),
        "ff_b1": 0.1 * normal(ks[17], (hidden,)),
        "ff_w2": normal(ks[18], (dim, hidden), 1.0 / math.sqrt(hidden)),
        "ff_b2": 0.1 * normal(ks[19], (dim,)),
    }

    x = normal(ks[20], (batch, seq, dim))
    x_encoder = normal(ks[21], (batch, enc_seq, dim))

    out = decoder_layer(x, x_encoder, params, heads=heads)
    out = jax.block_until_ready(out)

    ref = decoder_layer_reference(x, x_encoder, params, heads=heads)
    assert out.shape == (batch, seq, dim)
    assert out.dtype == jnp.float32
    # tolerance loosened vs. a pure-f32 kernel: matmuls use bf16 MXU operands
    # (f32 accumulation) and the softmax uses an approx EUP reciprocal.
    max_err = float(jnp.max(jnp.abs(out - ref)))
    assert jnp.allclose(out, ref, rtol=5e-2, atol=1e-1), max_err

    print("KERNEL_OK")
</pallas_src>

<mosaic_0001>
module attributes {stable_mosaic.version = 11 : i64} {
  func.func @_decoder_layer_kernel(%arg0: i32, %arg1: memref<2x8x32xf32, #tpu.memory_space<vmem>>, %arg2: memref<2x12x32xf32, #tpu.memory_space<vmem>>, %arg3: memref<1x32xf32, #tpu.memory_space<vmem>>, %arg4: memref<1x32xf32, #tpu.memory_space<vmem>>, %arg5: memref<1x32xf32, #tpu.memory_space<vmem>>, %arg6: memref<1x32xf32, #tpu.memory_space<vmem>>, %arg7: memref<1x32xf32, #tpu.memory_space<vmem>>, %arg8: memref<1x32xf32, #tpu.memory_space<vmem>>, %arg9: memref<32x96xbf16, #tpu.memory_space<vmem>>, %arg10: memref<32x32xbf16, #tpu.memory_space<vmem>>, %arg11: memref<1x32xf32, #tpu.memory_space<vmem>>, %arg12: memref<32x32xbf16, #tpu.memory_space<vmem>>, %arg13: memref<32x64xbf16, #tpu.memory_space<vmem>>, %arg14: memref<32x32xbf16, #tpu.memory_space<vmem>>, %arg15: memref<1x32xf32, #tpu.memory_space<vmem>>, %arg16: memref<32x64xbf16, #tpu.memory_space<vmem>>, %arg17: memref<1x64xf32, #tpu.memory_space<vmem>>, %arg18: memref<64x32xbf16, #tpu.memory_space<vmem>>, %arg19: memref<1x32xf32, #tpu.memory_space<vmem>>, %arg20: memref<2x8x32xf32, #tpu.memory_space<vmem>>) attributes {dimension_semantics = [#tpu.dimension_semantics<parallel>], iteration_bounds = array<i64: 1>, scalar_prefetch = 0 : i64, scratch_operands = 0 : i64, tpu.core_type = #tpu.core_type<tc>, window_params = [{transform_indices = @transform_0, window_bounds = array<i64: 2, 8, 32>}, {transform_indices = @transform_1, window_bounds = array<i64: 2, 12, 32>}, {pipeline_mode = #tpu.pipeline_mode<synchronous>, transform_indices = @transform_2, window_bounds = array<i64: 1, 32>}, {pipeline_mode = #tpu.pipeline_mode<synchronous>, transform_indices = @transform_3, window_bounds = array<i64: 1, 32>}, {pipeline_mode = #tpu.pipeline_mode<synchronous>, transform_indices = @transform_4, window_bounds = array<i64: 1, 32>}, {pipeline_mode = #tpu.pipeline_mode<synchronous>, transform_indices = @transform_5, window_bounds = array<i64: 1, 32>}, {pipeline_mode = #tpu.pipeline_mode<synchronous>, transform_indices = @transform_6, window_bounds = array<i64: 1, 32>}, {pipeline_mode = #tpu.pipeline_mode<synchronous>, transform_indices = @transform_7, window_bounds = array<i64: 1, 32>}, {pipeline_mode = #tpu.pipeline_mode<synchronous>, transform_indices = @transform_8, window_bounds = array<i64: 32, 96>}, {pipeline_mode = #tpu.pipeline_mode<synchronous>, transform_indices = @transform_9, window_bounds = array<i64: 32, 32>}, {pipeline_mode = #tpu.pipeline_mode<synchronous>, transform_indices = @transform_10, window_bounds = array<i64: 1, 32>}, {pipeline_mode = #tpu.pipeline_mode<synchronous>, transform_indices = @transform_11, window_bounds = array<i64: 32, 32>}, {pipeline_mode = #tpu.pipeline_mode<synchronous>, transform_indices = @transform_12, window_bounds = array<i64: 32, 64>}, {pipeline_mode = #tpu.pipeline_mode<synchronous>, transform_indices = @transform_13, window_bounds = array<i64: 32, 32>}, {pipeline_mode = #tpu.pipeline_mode<synchronous>, transform_indices = @transform_14, window_bounds = array<i64: 1, 32>}, {pipeline_mode = #tpu.pipeline_mode<synchronous>, transform_indices = @transform_15, window_bounds = array<i64: 32, 64>}, {pipeline_mode = #tpu.pipeline_mode<synchronous>, transform_indices = @transform_16, window_bounds = array<i64: 1, 64>}, {pipeline_mode = #tpu.pipeline_mode<synchronous>, transform_indices = @transform_17, window_bounds = array<i64: 64, 32>}, {pipeline_mode = #tpu.pipeline_mode<synchronous>, transform_indices = @transform_18, window_bounds = array<i64: 1, 32>}, {transform_indices = @transform_19, window_bounds = array<i64: 2, 8, 32>}]} {
    %c0 = arith.constant 0 : index
    %c0_0 = arith.constant 0 : index
    %c0_1 = arith.constant 0 : index
    %0 = vector.load %arg1[%c0, %c0_0, %c0_1] : memref<2x8x32xf32, #tpu.memory_space<vmem>>, vector<2x8x32xf32>
    %1 = vector.shape_cast %0 : vector<2x8x32xf32> to vector<16x32xf32>
    %c0_2 = arith.constant 0 : index
    %c0_3 = arith.constant 0 : index
    %c0_4 = arith.constant 0 : index
    %2 = vector.load %arg2[%c0_2, %c0_3, %c0_4] : memref<2x12x32xf32, #tpu.memory_space<vmem>>, vector<2x12x32xf32>
    %3 = vector.shape_cast %2 : vector<2x12x32xf32> to vector<24x32xf32>
    %4 = arith.truncf %3 : vector<24x32xf32> to vector<24x32xbf16>
    %c0_5 = arith.constant 0 : index
    %c0_6 = arith.constant 0 : index
    %5 = vector.load %arg3[%c0_5, %c0_6] : memref<1x32xf32, #tpu.memory_space<vmem>>, vector<1x32xf32>
    %c0_7 = arith.constant 0 : index
    %c0_8 = arith.constant 0 : index
    %6 = vector.load %arg4[%c0_7, %c0_8] : memref<1x32xf32, #tpu.memory_space<vmem>>, vector<1x32xf32>
    %cst = arith.constant dense<0.000000e+00> : vector<16xf32>
    %7 = vector.multi_reduction <add>, %1, %cst [1] : vector<16x32xf32> to vector<16xf32>
    %8 = vector.shape_cast %7 : vector<16xf32> to vector<16x1xf32>
    %cst_9 = arith.constant 3.200000e+01 : f32
    %9 = vector.broadcast %cst_9 : f32 to vector<16x1xf32>
    %10 = arith.divf %8, %9 : vector<16x1xf32>
    %11 = vector.broadcast %10 : vector<16x1xf32> to vector<16x32xf32>
    %12 = arith.subf %1, %11 : vector<16x32xf32>
    %13 = arith.mulf %12, %12 : vector<16x32xf32>
    %cst_10 = arith.constant dense<0.000000e+00> : vector<16xf32>
    %14 = vector.multi_reduction <add>, %13, %cst_10 [1] : vector<16x32xf32> to vector<16xf32>
    %15 = vector.shape_cast %14 : vector<16xf32> to vector<16x1xf32>
    %cst_11 = arith.constant 3.200000e+01 : f32
    %16 = vector.broadcast %cst_11 : f32 to vector<16x1xf32>
    %17 = arith.divf %15, %16 : vector<16x1xf32>
    %cst_12 = arith.constant 9.99999974E-6 : f32
    %18 = vector.broadcast %cst_12 : f32 to vector<16x1xf32>
    %19 = arith.addf %17, %18 : vector<16x1xf32>
    %20 = math.rsqrt %19 : vector<16x1xf32>
    %21 = vector.broadcast %20 : vector<16x1xf32> to vector<16x32xf32>
    %22 = arith.mulf %12, %21 : vector<16x32xf32>
    %23 = vector.broadcast %5 : vector<1x32xf32> to vector<16x32xf32>
    %24 = arith.mulf %22, %23 : vector<16x32xf32>
    %25 = vector.broadcast %6 : vector<1x32xf32> to vector<16x32xf32>
    %26 = arith.addf %24, %25 : vector<16x32xf32>
    %27 = arith.truncf %26 : vector<16x32xf32> to vector<16x32xbf16>
    %c0_13 = arith.constant 0 : index
    %c0_14 = arith.constant 0 : index
    %28 = vector.load %arg9[%c0_13, %c0_14] : memref<32x96xbf16, #tpu.memory_space<vmem>>, vector<32x96xbf16>
    %cst_15 = arith.constant dense<0.000000e+00> : vector<16x96xf32>
    %29 = tpu.matmul %27, %28, %cst_15 {dimension_numbers = #tpu.dot_dimension_numbers<[1], [0], [0], [1], [0, 0, 1, 1], [], []>} : vector<16x32xbf16>, vector<32x96xbf16>, vector<16x96xf32> -> vector<16x96xf32>
    %30 = vector.extract_strided_slice %29 {offsets = [0, 0], sizes = [16, 32], strides = [1, 1]} : vector<16x96xf32> to vector<16x32xf32>
    %31 = vector.extract_strided_slice %29 {offsets = [0, 32], sizes = [16, 32], strides = [1, 1]} : vector<16x96xf32> to vector<16x32xf32>
    %32 = vector.extract_strided_slice %29 {offsets = [0, 64], sizes = [16, 32], strides = [1, 1]} : vector<16x96xf32> to vector<16x32xf32>
    %c0_16 = arith.constant 0 : index
    %c0_17 = arith.constant 0 : index
    %33 = vector.load %arg10[%c0_16, %c0_17] : memref<32x32xbf16, #tpu.memory_space<vmem>>, vector<32x32xbf16>
    %c0_18 = arith.constant 0 : index
    %c0_19 = arith.constant 0 : index
    %34 = vector.load %arg11[%c0_18, %c0_19] : memref<1x32xf32, #tpu.memory_space<vmem>>, vector<1x32xf32>
    %35 = arith.truncf %30 : vector<16x32xf32> to vector<16x32xbf16>
    %36 = vector.shape_cast %35 : vector<16x32xbf16> to vector<2x8x32xbf16>
    %37 = arith.truncf %31 : vector<16x32xf32> to vector<16x32xbf16>
    %38 = vector.shape_cast %37 : vector<16x32xbf16> to vector<2x8x32xbf16>
    %39 = arith.truncf %32 : vector<16x32xf32> to vector<16x32xbf16>
    %40 = vector.shape_cast %39 : vector<16x32xbf16> to vector<2x8x32xbf16>
    %41 = vector.extract_strided_slice %36 {offsets = [0, 0, 0], sizes = [2, 8, 8], strides = [1, 1, 1]} : vector<2x8x32xbf16> to vector<2x8x8xbf16>
    %42 = vector.extract_strided_slice %38 {offsets = [0, 0, 0], sizes = [2, 8, 8], strides = [1, 1, 1]} : vector<2x8x32xbf16> to vector<2x8x8xbf16>
    "tpu.trace_start"() <{level = 10 : i32, message = "bqd,bkd->bqk"}> : () -> ()
    %cst_20 = arith.constant dense<0.000000e+00> : vector<2x8x8xf32>
    %43 = tpu.matmul %41, %42, %cst_20 {dimension_numbers = #tpu.dot_dimension_numbers<[2], [2], [1], [1], [0, 0, 0, 1, 1, 1], [0], [0]>} : vector<2x8x8xbf16>, vector<2x8x8xbf16>, vector<2x8x8xf32> -> vector<2x8x8xf32>
    "tpu.trace_stop"() : () -> ()
    %cst_21 = arith.constant dense<0xFF800000> : vector<2x8xf32>
    %44 = vector.multi_reduction <maximumf>, %43, %cst_21 [2] : vector<2x8x8xf32> to vector<2x8xf32>
    %45 = vector.shape_cast %44 : vector<2x8xf32> to vector<2x8x1xf32>
    %46 = vector.broadcast %45 : vector<2x8x1xf32> to vector<2x8x8xf32>
    %47 = arith.subf %43, %46 : vector<2x8x8xf32>
    %48 = math.exp %47 : vector<2x8x8xf32>
    %cst_22 = arith.constant dense<0.000000e+00> : vector<2x8xf32>
    %49 = vector.multi_reduction <add>, %48, %cst_22 [2] : vector<2x8x8xf32> to vector<2x8xf32>
    %50 = vector.shape_cast %49 : vector<2x8xf32> to vector<2x8x1xf32>
    %51 = tpu.reciprocal %50 {approx = true} : vector<2x8x1xf32> -> vector<2x8x1xf32>
    %52 = vector.broadcast %51 : vector<2x8x1xf32> to vector<2x8x8xf32>
    %53 = arith.mulf %48, %52 : vector<2x8x8xf32>
    %54 = arith.truncf %53 : vector<2x8x8xf32> to vector<2x8x8xbf16>
    %55 = vector.extract_strided_slice %40 {offsets = [0, 0, 0], sizes = [2, 8, 8], strides = [1, 1, 1]} : vector<2x8x32xbf16> to vector<2x8x8xbf16>
    "tpu.trace_start"() <{level = 10 : i32, message = "bqk,bkd->bqd"}> : () -> ()
    %cst_23 = arith.constant dense<0.000000e+00> : vector<2x8x8xf32>
    %56 = tpu.matmul %54, %55, %cst_23 {dimension_numbers = #tpu.dot_dimension_numbers<[2], [1], [1], [2], [0, 0, 0, 1, 1, 2], [0], [0]>} : vector<2x8x8xbf16>, vector<2x8x8xbf16>, vector<2x8x8xf32> -> vector<2x8x8xf32>
    "tpu.trace_stop"() : () -> ()
    %57 = vector.extract_strided_slice %36 {offsets = [0, 0, 8], sizes = [2, 8, 8], strides = [1, 1, 1]} : vector<2x8x32xbf16> to vector<2x8x8xbf16>
    %58 = vector.extract_strided_slice %38 {offsets = [0, 0, 8], sizes = [2, 8, 8], strides = [1, 1, 1]} : vector<2x8x32xbf16> to vector<2x8x8xbf16>
    "tpu.trace_start"() <{level = 10 : i32, message = "bqd,bkd->bqk"}> : () -> ()
    %cst_24 = arith.constant dense<0.000000e+00> : vector<2x8x8xf32>
    %59 = tpu.matmul %57, %58, %cst_24 {dimension_numbers = #tpu.dot_dimension_numbers<[2], [2], [1], [1], [0, 0, 0, 1, 1, 1], [0], [0]>} : vector<2x8x8xbf16>, vector<2x8x8xbf16>, vector<2x8x8xf32> -> vector<2x8x8xf32>
    "tpu.trace_stop"() : () -> ()
    %cst_25 = arith.constant dense<0xFF800000> : vector<2x8xf32>
    %60 = vector.multi_reduction <maximumf>, %59, %cst_25 [2] : vector<2x8x8xf32> to vector<2x8xf32>
    %61 = vector.shape_cast %60 : vector<2x8xf32> to vector<2x8x1xf32>
    %62 = vector.broadcast %61 : vector<2x8x1xf32> to vector<2x8x8xf32>
    %63 = arith.subf %59, %62 : vector<2x8x8xf32>
    %64 = math.exp %63 : vector<2x8x8xf32>
    %cst_26 = arith.constant dense<0.000000e+00> : vector<2x8xf32>
    %65 = vector.multi_reduction <add>, %64, %cst_26 [2] : vector<2x8x8xf32> to vector<2x8xf32>
    %66 = vector.shape_cast %65 : vector<2x8xf32> to vector<2x8x1xf32>
    %67 = tpu.reciprocal %66 {approx = true} : vector<2x8x1xf32> -> vector<2x8x1xf32>
    %68 = vector.broadcast %67 : vector<2x8x1xf32> to vector<2x8x8xf32>
    %69 = arith.mulf %64, %68 : vector<2x8x8xf32>
    %70 = arith.truncf %69 : vector<2x8x8xf32> to vector<2x8x8xbf16>
    %71 = vector.extract_strided_slice %40 {offsets = [0, 0, 8], sizes = [2, 8, 8], strides = [1, 1, 1]} : vector<2x8x32xbf16> to vector<2x8x8xbf16>
    "tpu.trace_start"() <{level = 10 : i32, message = "bqk,bkd->bqd"}> : () -> ()
    %cst_27 = arith.constant dense<0.000000e+00> : vector<2x8x8xf32>
    %72 = tpu.matmul %70, %71, %cst_27 {dimension_numbers = #tpu.dot_dimension_numbers<[2], [1], [1], [2], [0, 0, 0, 1, 1, 2], [0], [0]>} : vector<2x8x8xbf16>, vector<2x8x8xbf16>, vector<2x8x8xf32> -> vector<2x8x8xf32>
    "tpu.trace_stop"() : () -> ()
    %73 = vector.extract_strided_slice %36 {offsets = [0, 0, 16], sizes = [2, 8, 8], strides = [1, 1, 1]} : vector<2x8x32xbf16> to vector<2x8x8xbf16>
    %74 = vector.extract_strided_slice %38 {offsets = [0, 0, 16], sizes = [2, 8, 8], strides = [1, 1, 1]} : vector<2x8x32xbf16> to vector<2x8x8xbf16>
    "tpu.trace_start"() <{level = 10 : i32, message = "bqd,bkd->bqk"}> : () -> ()
    %cst_28 = arith.constant dense<0.000000e+00> : vector<2x8x8xf32>
    %75 = tpu.matmul %73, %74, %cst_28 {dimension_numbers = #tpu.dot_dimension_numbers<[2], [2], [1], [1], [0, 0, 0, 1, 1, 1], [0], [0]>} : vector<2x8x8xbf16>, vector<2x8x8xbf16>, vector<2x8x8xf32> -> vector<2x8x8xf32>
    "tpu.trace_stop"() : () -> ()
    %cst_29 = arith.constant dense<0xFF800000> : vector<2x8xf32>
    %76 = vector.multi_reduction <maximumf>, %75, %cst_29 [2] : vector<2x8x8xf32> to vector<2x8xf32>
    %77 = vector.shape_cast %76 : vector<2x8xf32> to vector<2x8x1xf32>
    %78 = vector.broadcast %77 : vector<2x8x1xf32> to vector<2x8x8xf32>
    %79 = arith.subf %75, %78 : vector<2x8x8xf32>
    %80 = math.exp %79 : vector<2x8x8xf32>
    %cst_30 = arith.constant dense<0.000000e+00> : vector<2x8xf32>
    %81 = vector.multi_reduction <add>, %80, %cst_30 [2] : vector<2x8x8xf32> to vector<2x8xf32>
    %82 = vector.shape_cast %81 : vector<2x8xf32> to vector<2x8x1xf32>
    %83 = tpu.reciprocal %82 {approx = true} : vector<2x8x1xf32> -> vector<2x8x1xf32>
    %84 = vector.broadcast %83 : vector<2x8x1xf32> to vector<2x8x8xf32>
    %85 = arith.mulf %80, %84 : vector<2x8x8xf32>
    %86 = arith.truncf %85 : vector<2x8x8xf32> to vector<2x8x8xbf16>
    %87 = vector.extract_strided_slice %40 {offsets = [0, 0, 16], sizes = [2, 8, 8], strides = [1, 1, 1]} : vector<2x8x32xbf16> to vector<2x8x8xbf16>
    "tpu.trace_start"() <{level = 10 : i32, message = "bqk,bkd->bqd"}> : () -> ()
    %cst_31 = arith.constant dense<0.000000e+00> : vector<2x8x8xf32>
    %88 = tpu.matmul %86, %87, %cst_31 {dimension_numbers = #tpu.dot_dimension_numbers<[2], [1], [1], [2], [0, 0, 0, 1, 1, 2], [0], [0]>} : vector<2x8x8xbf16>, vector<2x8x8xbf16>, vector<2x8x8xf32> -> vector<2x8x8xf32>
    "tpu.trace_stop"() : () -> ()
    %89 = vector.extract_strided_slice %36 {offsets = [0, 0, 24], sizes = [2, 8, 8], strides = [1, 1, 1]} : vector<2x8x32xbf16> to vector<2x8x8xbf16>
    %90 = vector.extract_strided_slice %38 {offsets = [0, 0, 24], sizes = [2, 8, 8], strides = [1, 1, 1]} : vector<2x8x32xbf16> to vector<2x8x8xbf16>
    "tpu.trace_start"() <{level = 10 : i32, message = "bqd,bkd->bqk"}> : () -> ()
    %cst_32 = arith.constant dense<0.000000e+00> : vector<2x8x8xf32>
    %91 = tpu.matmul %89, %90, %cst_32 {dimension_numbers = #tpu.dot_dimension_numbers<[2], [2], [1], [1], [0, 0, 0, 1, 1, 1], [0], [0]>} : vector<2x8x8xbf16>, vector<2x8x8xbf16>, vector<2x8x8xf32> -> vector<2x8x8xf32>
    "tpu.trace_stop"() : () -> ()
    %cst_33 = arith.constant dense<0xFF800000> : vector<2x8xf32>
    %92 = vector.multi_reduction <maximumf>, %91, %cst_33 [2] : vector<2x8x8xf32> to vector<2x8xf32>
    %93 = vector.shape_cast %92 : vector<2x8xf32> to vector<2x8x1xf32>
    %94 = vector.broadcast %93 : vector<2x8x1xf32> to vector<2x8x8xf32>
    %95 = arith.subf %91, %94 : vector<2x8x8xf32>
    %96 = math.exp %95 : vector<2x8x8xf32>
    %cst_34 = arith.constant dense<0.000000e+00> : vector<2x8xf32>
    %97 = vector.multi_reduction <add>, %96, %cst_34 [2] : vector<2x8x8xf32> to vector<2x8xf32>
    %98 = vector.shape_cast %97 : vector<2x8xf32> to vector<2x8x1xf32>
    %99 = tpu.reciprocal %98 {approx = true} : vector<2x8x1xf32> -> vector<2x8x1xf32>
    %100 = vector.broadcast %99 : vector<2x8x1xf32> to vector<2x8x8xf32>
    %101 = arith.mulf %96, %100 : vector<2x8x8xf32>
    %102 = arith.truncf %101 : vector<2x8x8xf32> to vector<2x8x8xbf16>
    %103 = vector.extract_strided_slice %40 {offsets = [0, 0, 24], sizes = [2, 8, 8], strides = [1, 1, 1]} : vector<2x8x32xbf16> to vector<2x8x8xbf16>
    "tpu.trace_start"() <{level = 10 : i32, message = "bqk,bkd->bqd"}> : () -> ()
    %cst_35 = arith.constant dense<0.000000e+00> : vector<2x8x8xf32>
    %104 = tpu.matmul %102, %103, %cst_35 {dimension_numbers = #tpu.dot_dimension_numbers<[2], [1], [1], [2], [0, 0, 0, 1, 1, 2], [0], [0]>} : vector<2x8x8xbf16>, vector<2x8x8xbf16>, vector<2x8x8xf32> -> vector<2x8x8xf32>
    "tpu.trace_stop"() : () -> ()
    %105 = tpu.concatenate %56, %72, %88, %104 in 2 : vector<2x8x8xf32>, vector<2x8x8xf32>, vector<2x8x8xf32>, vector<2x8x8xf32> -> vector<2x8x32xf32>
    %106 = vector.shape_cast %105 : vector<2x8x32xf32> to vector<16x32xf32>
    %107 = arith.truncf %106 : vector<16x32xf32> to vector<16x32xbf16>
    %cst_36 = arith.constant dense<0.000000e+00> : vector<16x32xf32>
    %108 = tpu.matmul %107, %33, %cst_36 {dimension_numbers = #tpu.dot_dimension_numbers<[1], [0], [0], [1], [0, 0, 1, 1], [], []>} : vector<16x32xbf16>, vector<32x32xbf16>, vector<16x32xf32> -> vector<16x32xf32>
    %109 = vector.broadcast %34 : vector<1x32xf32> to vector<16x32xf32>
    %110 = arith.addf %108, %109 : vector<16x32xf32>
    %111 = arith.addf %1, %110 : vector<16x32xf32>
    %c0_37 = arith.constant 0 : index
    %c0_38 = arith.constant 0 : index
    %112 = vector.load %arg5[%c0_37, %c0_38] : memref<1x32xf32, #tpu.memory_space<vmem>>, vector<1x32xf32>
    %c0_39 = arith.constant 0 : index
    %c0_40 = arith.constant 0 : index
    %113 = vector.load %arg6[%c0_39, %c0_40] : memref<1x32xf32, #tpu.memory_space<vmem>>, vector<1x32xf32>
    %cst_41 = arith.constant dense<0.000000e+00> : vector<16xf32>
    %114 = vector.multi_reduction <add>, %111, %cst_41 [1] : vector<16x32xf32> to vector<16xf32>
    %115 = vector.shape_cast %114 : vector<16xf32> to vector<16x1xf32>
    %cst_42 = arith.constant 3.200000e+01 : f32
    %116 = vector.broadcast %cst_42 : f32 to vector<16x1xf32>
    %117 = arith.divf %115, %116 : vector<16x1xf32>
    %118 = vector.broadcast %117 : vector<16x1xf32> to vector<16x32xf32>
    %119 = arith.subf %111, %118 : vector<16x32xf32>
    %120 = arith.mulf %119, %119 : vector<16x32xf32>
    %cst_43 = arith.constant dense<0.000000e+00> : vector<16xf32>
    %121 = vector.multi_reduction <add>, %120, %cst_43 [1] : vector<16x32xf32> to vector<16xf32>
    %122 = vector.shape_cast %121 : vector<16xf32> to vector<16x1xf32>
    %cst_44 = arith.constant 3.200000e+01 : f32
    %123 = vector.broadcast %cst_44 : f32 to vector<16x1xf32>
    %124 = arith.divf %122, %123 : vector<16x1xf32>
    %cst_45 = arith.constant 9.99999974E-6 : f32
    %125 = vector.broadcast %cst_45 : f32 to vector<16x1xf32>
    %126 = arith.addf %124, %125 : vector<16x1xf32>
    %127 = math.rsqrt %126 : vector<16x1xf32>
    %128 = vector.broadcast %127 : vector<16x1xf32> to vector<16x32xf32>
    %129 = arith.mulf %119, %128 : vector<16x32xf32>
    %130 = vector.broadcast %112 : vector<1x32xf32> to vector<16x32xf32>
    %131 = arith.mulf %129, %130 : vector<16x32xf32>
    %132 = vector.broadcast %113 : vector<1x32xf32> to vector<16x32xf32>
    %133 = arith.addf %131, %132 : vector<16x32xf32>
    %134 = arith.truncf %133 : vector<16x32xf32> to vector<16x32xbf16>
    %c0_46 = arith.constant 0 : index
    %c0_47 = arith.constant 0 : index
    %135 = vector.load %arg12[%c0_46, %c0_47] : memref<32x32xbf16, #tpu.memory_space<vmem>>, vector<32x32xbf16>
    %cst_48 = arith.constant dense<0.000000e+00> : vector<16x32xf32>
    %136 = tpu.matmul %134, %135, %cst_48 {dimension_numbers = #tpu.dot_dimension_numbers<[1], [0], [0], [1], [0, 0, 1, 1], [], []>} : vector<16x32xbf16>, vector<32x32xbf16>, vector<16x32xf32> -> vector<16x32xf32>
    %c0_49 = arith.constant 0 : index
    %c0_50 = arith.constant 0 : index
    %137 = vector.load %arg13[%c0_49, %c0_50] : memref<32x64xbf16, #tpu.memory_space<vmem>>, vector<32x64xbf16>
    %cst_51 = arith.constant dense<0.000000e+00> : vector<24x64xf32>
    %138 = tpu.matmul %4, %137, %cst_51 {dimension_numbers = #tpu.dot_dimension_numbers<[1], [0], [0], [1], [0, 0, 1, 1], [], []>} : vector<24x32xbf16>, vector<32x64xbf16>, vector<24x64xf32> -> vector<24x64xf32>
    %139 = vector.extract_strided_slice %138 {offsets = [0, 0], sizes = [24, 32], strides = [1, 1]} : vector<24x64xf32> to vector<24x32xf32>
    %140 = vector.extract_strided_slice %138 {offsets = [0, 32], sizes = [24, 32], strides = [1, 1]} : vector<24x64xf32> to vector<24x32xf32>
    %c0_52 = arith.constant 0 : index
    %c0_53 = arith.constant 0 : index
    %141 = vector.load %arg14[%c0_52, %c0_53] : memref<32x32xbf16, #tpu.memory_space<vmem>>, vector<32x32xbf16>
    %c0_54 = arith.constant 0 : index
    %c0_55 = arith.constant 0 : index
    %142 = vector.load %arg15[%c0_54, %c0_55] : memref<1x32xf32, #tpu.memory_space<vmem>>, vector<1x32xf32>
    %143 = arith.truncf %136 : vector<16x32xf32> to vector<16x32xbf16>
    %144 = vector.shape_cast %143 : vector<16x32xbf16> to vector<2x8x32xbf16>
    %145 = arith.truncf %139 : vector<24x32xf32> to vector<24x32xbf16>
    %146 = vector.shape_cast %145 : vector<24x32xbf16> to vector<2x12x32xbf16>
    %147 = arith.truncf %140 : vector<24x32xf32> to vector<24x32xbf16>
    %148 = vector.shape_cast %147 : vector<24x32xbf16> to vector<2x12x32xbf16>
    %149 = vector.extract_strided_slice %144 {offsets = [0, 0, 0], sizes = [2, 8, 8], strides = [1, 1, 1]} : vector<2x8x32xbf16> to vector<2x8x8xbf16>
    %150 = vector.extract_strided_slice %146 {offsets = [0, 0, 0], sizes = [2, 12, 8], strides = [1, 1, 1]} : vector<2x12x32xbf16> to vector<2x12x8xbf16>
    "tpu.trace_start"() <{level = 10 : i32, message = "bqd,bkd->bqk"}> : () -> ()
    %cst_56 = arith.constant dense<0.000000e+00> : vector<2x8x12xf32>
    %151 = tpu.matmul %149, %150, %cst_56 {dimension_numbers = #tpu.dot_dimension_numbers<[2], [2], [1], [1], [0, 0, 0, 1, 1, 1], [0], [0]>} : vector<2x8x8xbf16>, vector<2x12x8xbf16>, vector<2x8x12xf32> -> vector<2x8x12xf32>
    "tpu.trace_stop"() : () -> ()
    %cst_57 = arith.constant dense<0xFF800000> : vector<2x8xf32>
    %152 = vector.multi_reduction <maximumf>, %151, %cst_57 [2] : vector<2x8x12xf32> to vector<2x8xf32>
    %153 = vector.shape_cast %152 : vector<2x8xf32> to vector<2x8x1xf32>
    %154 = vector.broadcast %153 : vector<2x8x1xf32> to vector<2x8x12xf32>
    %155 = arith.subf %151, %154 : vector<2x8x12xf32>
    %156 = math.exp %155 : vector<2x8x12xf32>
    %cst_58 = arith.constant dense<0.000000e+00> : vector<2x8xf32>
    %157 = vector.multi_reduction <add>, %156, %cst_58 [2] : vector<2x8x12xf32> to vector<2x8xf32>
    %158 = vector.shape_cast %157 : vector<2x8xf32> to vector<2x8x1xf32>
    %159 = tpu.reciprocal %158 {approx = true} : vector<2x8x1xf32> -> vector<2x8x1xf32>
    %160 = vector.broadcast %159 : vector<2x8x1xf32> to vector<2x8x12xf32>
    %161 = arith.mulf %156, %160 : vector<2x8x12xf32>
    %162 = arith.truncf %161 : vector<2x8x12xf32> to vector<2x8x12xbf16>
    %163 = vector.extract_strided_slice %148 {offsets = [0, 0, 0], sizes = [2, 12, 8], strides = [1, 1, 1]} : vector<2x12x32xbf16> to vector<2x12x8xbf16>
    "tpu.trace_start"() <{level = 10 : i32, message = "bqk,bkd->bqd"}> : () -> ()
    %cst_59 = arith.constant dense<0.000000e+00> : vector<2x8x8xf32>
    %164 = tpu.matmul %162, %163, %cst_59 {dimension_numbers = #tpu.dot_dimension_numbers<[2], [1], [1], [2], [0, 0, 0, 1, 1, 2], [0], [0]>} : vector<2x8x12xbf16>, vector<2x12x8xbf16>, vector<2x8x8xf32> -> vector<2x8x8xf32>
    "tpu.trace_stop"() : () -> ()
    %165 = vector.extract_strided_slice %144 {offsets = [0, 0, 8], sizes = [2, 8, 8], strides = [1, 1, 1]} : vector<2x8x32xbf16> to vector<2x8x8xbf16>
    %166 = vector.extract_strided_slice %146 {offsets = [0, 0, 8], sizes = [2, 12, 8], strides = [1, 1, 1]} : vector<2x12x32xbf16> to vector<2x12x8xbf16>
    "tpu.trace_start"() <{level = 10 : i32, message = "bqd,bkd->bqk"}> : () -> ()
    %cst_60 = arith.constant dense<0.000000e+00> : vector<2x8x12xf32>
    %167 = tpu.matmul %165, %166, %cst_60 {dimension_numbers = #tpu.dot_dimension_numbers<[2], [2], [1], [1], [0, 0, 0, 1, 1, 1], [0], [0]>} : vector<2x8x8xbf16>, vector<2x12x8xbf16>, vector<2x8x12xf32> -> vector<2x8x12xf32>
    "tpu.trace_stop"() : () -> ()
    %cst_61 = arith.constant dense<0xFF800000> : vector<2x8xf32>
    %168 = vector.multi_reduction <maximumf>, %167, %cst_61 [2] : vector<2x8x12xf32> to vector<2x8xf32>
    %169 = vector.shape_cast %168 : vector<2x8xf32> to vector<2x8x1xf32>
    %170 = vector.broadcast %169 : vector<2x8x1xf32> to vector<2x8x12xf32>
    %171 = arith.subf %167, %170 : vector<2x8x12xf32>
    %172 = math.exp %171 : vector<2x8x12xf32>
    %cst_62 = arith.constant dense<0.000000e+00> : vector<2x8xf32>
    %173 = vector.multi_reduction <add>, %172, %cst_62 [2] : vector<2x8x12xf32> to vector<2x8xf32>
    %174 = vector.shape_cast %173 : vector<2x8xf32> to vector<2x8x1xf32>
    %175 = tpu.reciprocal %174 {approx = true} : vector<2x8x1xf32> -> vector<2x8x1xf32>
    %176 = vector.broadcast %175 : vector<2x8x1xf32> to vector<2x8x12xf32>
    %177 = arith.mulf %172, %176 : vector<2x8x12xf32>
    %178 = arith.truncf %177 : vector<2x8x12xf32> to vector<2x8x12xbf16>
    %179 = vector.extract_strided_slice %148 {offsets = [0, 0, 8], sizes = [2, 12, 8], strides = [1, 1, 1]} : vector<2x12x32xbf16> to vector<2x12x8xbf16>
    "tpu.trace_start"() <{level = 10 : i32, message = "bqk,bkd->bqd"}> : () -> ()
    %cst_63 = arith.constant dense<0.000000e+00> : vector<2x8x8xf32>
    %180 = tpu.matmul %178, %179, %cst_63 {dimension_numbers = #tpu.dot_dimension_numbers<[2], [1], [1], [2], [0, 0, 0, 1, 1, 2], [0], [0]>} : vector<2x8x12xbf16>, vector<2x12x8xbf16>, vector<2x8x8xf32> -> vector<2x8x8xf32>
    "tpu.trace_stop"() : () -> ()
    %181 = vector.extract_strided_slice %144 {offsets = [0, 0, 16], sizes = [2, 8, 8], strides = [1, 1, 1]} : vector<2x8x32xbf16> to vector<2x8x8xbf16>
    %182 = vector.extract_strided_slice %146 {offsets = [0, 0, 16], sizes = [2, 12, 8], strides = [1, 1, 1]} : vector<2x12x32xbf16> to vector<2x12x8xbf16>
    "tpu.trace_start"() <{level = 10 : i32, message = "bqd,bkd->bqk"}> : () -> ()
    %cst_64 = arith.constant dense<0.000000e+00> : vector<2x8x12xf32>
    %183 = tpu.matmul %181, %182, %cst_64 {dimension_numbers = #tpu.dot_dimension_numbers<[2], [2], [1], [1], [0, 0, 0, 1, 1, 1], [0], [0]>} : vector<2x8x8xbf16>, vector<2x12x8xbf16>, vector<2x8x12xf32> -> vector<2x8x12xf32>
    "tpu.trace_stop"() : () -> ()
    %cst_65 = arith.constant dense<0xFF800000> : vector<2x8xf32>
    %184 = vector.multi_reduction <maximumf>, %183, %cst_65 [2] : vector<2x8x12xf32> to vector<2x8xf32>
    %185 = vector.shape_cast %184 : vector<2x8xf32> to vector<2x8x1xf32>
    %186 = vector.broadcast %185 : vector<2x8x1xf32> to vector<2x8x12xf32>
    %187 = arith.subf %183, %186 : vector<2x8x12xf32>
    %188 = math.exp %187 : vector<2x8x12xf32>
    %cst_66 = arith.constant dense<0.000000e+00> : vector<2x8xf32>
    %189 = vector.multi_reduction <add>, %188, %cst_66 [2] : vector<2x8x12xf32> to vector<2x8xf32>
    %190 = vector.shape_cast %189 : vector<2x8xf32> to vector<2x8x1xf32>
    %191 = tpu.reciprocal %190 {approx = true} : vector<2x8x1xf32> -> vector<2x8x1xf32>
    %192 = vector.broadcast %191 : vector<2x8x1xf32> to vector<2x8x12xf32>
    %193 = arith.mulf %188, %192 : vector<2x8x12xf32>
    %194 = arith.truncf %193 : vector<2x8x12xf32> to vector<2x8x12xbf16>
    %195 = vector.extract_strided_slice %148 {offsets = [0, 0, 16], sizes = [2, 12, 8], strides = [1, 1, 1]} : vector<2x12x32xbf16> to vector<2x12x8xbf16>
    "tpu.trace_start"() <{level = 10 : i32, message = "bqk,bkd->bqd"}> : () -> ()
    %cst_67 = arith.constant dense<0.000000e+00> : vector<2x8x8xf32>
    %196 = tpu.matmul %194, %195, %cst_67 {dimension_numbers = #tpu.dot_dimension_numbers<[2], [1], [1], [2], [0, 0, 0, 1, 1, 2], [0], [0]>} : vector<2x8x12xbf16>, vector<2x12x8xbf16>, vector<2x8x8xf32> -> vector<2x8x8xf32>
    "tpu.trace_stop"() : () -> ()
    %197 = vector.extract_strided_slice %144 {offsets = [0, 0, 24], sizes = [2, 8, 8], strides = [1, 1, 1]} : vector<2x8x32xbf16> to vector<2x8x8xbf16>
    %198 = vector.extract_strided_slice %146 {offsets = [0, 0, 24], sizes = [2, 12, 8], strides = [1, 1, 1]} : vector<2x12x32xbf16> to vector<2x12x8xbf16>
    "tpu.trace_start"() <{level = 10 : i32, message = "bqd,bkd->bqk"}> : () -> ()
    %cst_68 = arith.constant dense<0.000000e+00> : vector<2x8x12xf32>
    %199 = tpu.matmul %197, %198, %cst_68 {dimension_numbers = #tpu.dot_dimension_numbers<[2], [2], [1], [1], [0, 0, 0, 1, 1, 1], [0], [0]>} : vector<2x8x8xbf16>, vector<2x12x8xbf16>, vector<2x8x12xf32> -> vector<2x8x12xf32>
    "tpu.trace_stop"() : () -> ()
    %cst_69 = arith.constant dense<0xFF800000> : vector<2x8xf32>
    %200 = vector.multi_reduction <maximumf>, %199, %cst_69 [2] : vector<2x8x12xf32> to vector<2x8xf32>
    %201 = vector.shape_cast %200 : vector<2x8xf32> to vector<2x8x1xf32>
    %202 = vector.broadcast %201 : vector<2x8x1xf32> to vector<2x8x12xf32>
    %203 = arith.subf %199, %202 : vector<2x8x12xf32>
    %204 = math.exp %203 : vector<2x8x12xf32>
    %cst_70 = arith.constant dense<0.000000e+00> : vector<2x8xf32>
    %205 = vector.multi_reduction <add>, %204, %cst_70 [2] : vector<2x8x12xf32> to vector<2x8xf32>
    %206 = vector.shape_cast %205 : vector<2x8xf32> to vector<2x8x1xf32>
    %207 = tpu.reciprocal %206 {approx = true} : vector<2x8x1xf32> -> vector<2x8x1xf32>
    %208 = vector.broadcast %207 : vector<2x8x1xf32> to vector<2x8x12xf32>
    %209 = arith.mulf %204, %208 : vector<2x8x12xf32>
    %210 = arith.truncf %209 : vector<2x8x12xf32> to vector<2x8x12xbf16>
    %211 = vector.extract_strided_slice %148 {offsets = [0, 0, 24], sizes = [2, 12, 8], strides = [1, 1, 1]} : vector<2x12x32xbf16> to vector<2x12x8xbf16>
    "tpu.trace_start"() <{level = 10 : i32, message = "bqk,bkd->bqd"}> : () -> ()
    %cst_71 = arith.constant dense<0.000000e+00> : vector<2x8x8xf32>
    %212 = tpu.matmul %210, %211, %cst_71 {dimension_numbers = #tpu.dot_dimension_numbers<[2], [1], [1], [2], [0, 0, 0, 1, 1, 2], [0], [0]>} : vector<2x8x12xbf16>, vector<2x12x8xbf16>, vector<2x8x8xf32> -> vector<2x8x8xf32>
    "tpu.trace_stop"() : () -> ()
    %213 = tpu.concatenate %164, %180, %196, %212 in 2 : vector<2x8x8xf32>, vector<2x8x8xf32>, vector<2x8x8xf32>, vector<2x8x8xf32> -> vector<2x8x32xf32>
    %214 = vector.shape_cast %213 : vector<2x8x32xf32> to vector<16x32xf32>
    %215 = arith.truncf %214 : vector<16x32xf32> to vector<16x32xbf16>
    %cst_72 = arith.constant dense<0.000000e+00> : vector<16x32xf32>
    %216 = tpu.matmul %215, %141, %cst_72 {dimension_numbers = #tpu.dot_dimension_numbers<[1], [0], [0], [1], [0, 0, 1, 1], [], []>} : vector<16x32xbf16>, vector<32x32xbf16>, vector<16x32xf32> -> vector<16x32xf32>
    %217 = vector.broadcast %142 : vector<1x32xf32> to vector<16x32xf32>
    %218 = arith.addf %216, %217 : vector<16x32xf32>
    %219 = arith.addf %111, %218 : vector<16x32xf32>
    %c0_73 = arith.constant 0 : index
    %c0_74 = arith.constant 0 : index
    %220 = vector.load %arg7[%c0_73, %c0_74] : memref<1x32xf32, #tpu.memory_space<vmem>>, vector<1x32xf32>
    %c0_75 = arith.constant 0 : index
    %c0_76 = arith.constant 0 : index
    %221 = vector.load %arg8[%c0_75, %c0_76] : memref<1x32xf32, #tpu.memory_space<vmem>>, vector<1x32xf32>
    %cst_77 = arith.constant dense<0.000000e+00> : vector<16xf32>
    %222 = vector.multi_reduction <add>, %219, %cst_77 [1] : vector<16x32xf32> to vector<16xf32>
    %223 = vector.shape_cast %222 : vector<16xf32> to vector<16x1xf32>
    %cst_78 = arith.constant 3.200000e+01 : f32
    %224 = vector.broadcast %cst_78 : f32 to vector<16x1xf32>
    %225 = arith.divf %223, %224 : vector<16x1xf32>
    %226 = vector.broadcast %225 : vector<16x1xf32> to vector<16x32xf32>
    %227 = arith.subf %219, %226 : vector<16x32xf32>
    %228 = arith.mulf %227, %227 : vector<16x32xf32>
    %cst_79 = arith.constant dense<0.000000e+00> : vector<16xf32>
    %229 = vector.multi_reduction <add>, %228, %cst_79 [1] : vector<16x32xf32> to vector<16xf32>
    %230 = vector.shape_cast %229 : vector<16xf32> to vector<16x1xf32>
    %cst_80 = arith.constant 3.200000e+01 : f32
    %231 = vector.broadcast %cst_80 : f32 to vector<16x1xf32>
    %232 = arith.divf %230, %231 : vector<16x1xf32>
    %cst_81 = arith.constant 9.99999974E-6 : f32
    %233 = vector.broadcast %cst_81 : f32 to vector<16x1xf32>
    %234 = arith.addf %232, %233 : vector<16x1xf32>
    %235 = math.rsqrt %234 : vector<16x1xf32>
    %236 = vector.broadcast %235 : vector<16x1xf32> to vector<16x32xf32>
    %237 = arith.mulf %227, %236 : vector<16x32xf32>
    %238 = vector.broadcast %220 : vector<1x32xf32> to vector<16x32xf32>
    %239 = arith.mulf %237, %238 : vector<16x32xf32>
    %240 = vector.broadcast %221 : vector<1x32xf32> to vector<16x32xf32>
    %241 = arith.addf %239, %240 : vector<16x32xf32>
    %242 = arith.truncf %241 : vector<16x32xf32> to vector<16x32xbf16>
    %c0_82 = arith.constant 0 : index
    %c0_83 = arith.constant 0 : index
    %243 = vector.load %arg16[%c0_82, %c0_83] : memref<32x64xbf16, #tpu.memory_space<vmem>>, vector<32x64xbf16>
    %cst_84 = arith.constant dense<0.000000e+00> : vector<16x64xf32>
    %244 = tpu.matmul %242, %243, %cst_84 {dimension_numbers = #tpu.dot_dimension_numbers<[1], [0], [0], [1], [0, 0, 1, 1], [], []>} : vector<16x32xbf16>, vector<32x64xbf16>, vector<16x64xf32> -> vector<16x64xf32>
    %c0_85 = arith.constant 0 : index
    %c0_86 = arith.constant 0 : index
    %245 = vector.load %arg17[%c0_85, %c0_86] : memref<1x64xf32, #tpu.memory_space<vmem>>, vector<1x64xf32>
    %246 = vector.broadcast %245 : vector<1x64xf32> to vector<16x64xf32>
    %247 = arith.addf %244, %246 : vector<16x64xf32>
    %cst_87 = arith.constant 0.000000e+00 : f32
    %248 = vector.broadcast %cst_87 : f32 to vector<16x64xf32>
    %249 = arith.maximumf %247, %248 : vector<16x64xf32>
    %250 = arith.truncf %249 : vector<16x64xf32> to vector<16x64xbf16>
    %c0_88 = arith.constant 0 : index
    %c0_89 = arith.constant 0 : index
    %251 = vector.load %arg18[%c0_88, %c0_89] : memref<64x32xbf16, #tpu.memory_space<vmem>>, vector<64x32xbf16>
    %cst_90 = arith.constant dense<0.000000e+00> : vector<16x32xf32>
    %252 = tpu.matmul %250, %251, %cst_90 {dimension_numbers = #tpu.dot_dimension_numbers<[1], [0], [0], [1], [0, 0, 1, 1], [], []>} : vector<16x64xbf16>, vector<64x32xbf16>, vector<16x32xf32> -> vector<16x32xf32>
    %253 = arith.addf %219, %252 : vector<16x32xf32>
    %c0_91 = arith.constant 0 : index
    %c0_92 = arith.constant 0 : index
    %254 = vector.load %arg19[%c0_91, %c0_92] : memref<1x32xf32, #tpu.memory_space<vmem>>, vector<1x32xf32>
    %255 = vector.broadcast %254 : vector<1x32xf32> to vector<16x32xf32>
    %256 = arith.addf %253, %255 : vector<16x32xf32>
    %257 = vector.shape_cast %256 : vector<16x32xf32> to vector<2x8x32xf32>
    %c0_93 = arith.constant 0 : index
    %c0_94 = arith.constant 0 : index
    %c0_95 = arith.constant 0 : index
    %258 = vector.load %arg20[%c0_93, %c0_94, %c0_95] : memref<2x8x32xf32, #tpu.memory_space<vmem>>, vector<2x8x32xf32>
    tpu.vector_store %arg20[%c0_93, %c0_94, %c0_95], %257 {strides = array<i32>} : memref<2x8x32xf32, #tpu.memory_space<vmem>>, vector<2x8x32xf32>,
    return
  }
  func.func @transform_0(%arg0: i32) -> (i32, i32, i32) {
    %c0_i32 = arith.constant 0 : i32
    %c0_i32_0 = arith.constant 0 : i32
    %c0_i32_1 = arith.constant 0 : i32
    return %arg0, %c0_i32, %c0_i32_0 : i32, i32, i32
  }
  func.func @transform_1(%arg0: i32) -> (i32, i32, i32) {
    %c0_i32 = arith.constant 0 : i32
    %c0_i32_0 = arith.constant 0 : i32
    %c0_i32_1 = arith.constant 0 : i32
    return %arg0, %c0_i32, %c0_i32_0 : i32, i32, i32
  }
  func.func @transform_2(%arg0: i32) -> (i32, i32) {
    %c0_i32 = arith.constant 0 : i32
    %c0_i32_0 = arith.constant 0 : i32
    %c0_i32_1 = arith.constant 0 : i32
    return %c0_i32, %c0_i32_0 : i32, i32
  }
  func.func @transform_3(%arg0: i32) -> (i32, i32) {
    %c0_i32 = arith.constant 0 : i32
    %c0_i32_0 = arith.constant 0 : i32
    %c0_i32_1 = arith.constant 0 : i32
    return %c0_i32, %c0_i32_0 : i32, i32
  }
  func.func @transform_4(%arg0: i32) -> (i32, i32) {
    %c0_i32 = arith.constant 0 : i32
    %c0_i32_0 = arith.constant 0 : i32
    %c0_i32_1 = arith.constant 0 : i32
    return %c0_i32, %c0_i32_0 : i32, i32
  }
  func.func @transform_5(%arg0: i32) -> (i32, i32) {
    %c0_i32 = arith.constant 0 : i32
    %c0_i32_0 = arith.constant 0 : i32
    %c0_i32_1 = arith.constant 0 : i32
    return %c0_i32, %c0_i32_0 : i32, i32
  }
  func.func @transform_6(%arg0: i32) -> (i32, i32) {
    %c0_i32 = arith.constant 0 : i32
    %c0_i32_0 = arith.constant 0 : i32
    %c0_i32_1 = arith.constant 0 : i32
    return %c0_i32, %c0_i32_0 : i32, i32
  }
  func.func @transform_7(%arg0: i32) -> (i32, i32) {
    %c0_i32 = arith.constant 0 : i32
    %c0_i32_0 = arith.constant 0 : i32
    %c0_i32_1 = arith.constant 0 : i32
    return %c0_i32, %c0_i32_0 : i32, i32
  }
  func.func @transform_8(%arg0: i32) -> (i32, i32) {
    %c0_i32 = arith.constant 0 : i32
    %c0_i32_0 = arith.constant 0 : i32
    %c0_i32_1 = arith.constant 0 : i32
    return %c0_i32, %c0_i32_0 : i32, i32
  }
  func.func @transform_9(%arg0: i32) -> (i32, i32) {
    %c0_i32 = arith.constant 0 : i32
    %c0_i32_0 = arith.constant 0 : i32
    %c0_i32_1 = arith.constant 0 : i32
    return %c0_i32, %c0_i32_0 : i32, i32
  }
  func.func @transform_10(%arg0: i32) -> (i32, i32) {
    %c0_i32 = arith.constant 0 : i32
    %c0_i32_0 = arith.constant 0 : i32
    %c0_i32_1 = arith.constant 0 : i32
    return %c0_i32, %c0_i32_0 : i32, i32
  }
  func.func @transform_11(%arg0: i32) -> (i32, i32) {
    %c0_i32 = arith.constant 0 : i32
    %c0_i32_0 = arith.constant 0 : i32
    %c0_i32_1 = arith.constant 0 : i32
    return %c0_i32, %c0_i32_0 : i32, i32
  }
  func.func @transform_12(%arg0: i32) -> (i32, i32) {
    %c0_i32 = arith.constant 0 : i32
    %c0_i32_0 = arith.constant 0 : i32
    %c0_i32_1 = arith.constant 0 : i32
    return %c0_i32, %c0_i32_0 : i32, i32
  }
  func.func @transform_13(%arg0: i32) -> (i32, i32) {
    %c0_i32 = arith.constant 0 : i32
    %c0_i32_0 = arith.constant 0 : i32
    %c0_i32_1 = arith.constant 0 : i32
    return %c0_i32, %c0_i32_0 : i32, i32
  }
  func.func @transform_14(%arg0: i32) -> (i32, i32) {
    %c0_i32 = arith.constant 0 : i32
    %c0_i32_0 = arith.constant 0 : i32
    %c0_i32_1 = arith.constant 0 : i32
    return %c0_i32, %c0_i32_0 : i32, i32
  }
  func.func @transform_15(%arg0: i32) -> (i32, i32) {
    %c0_i32 = arith.constant 0 : i32
    %c0_i32_0 = arith.constant 0 : i32
    %c0_i32_1 = arith.constant 0 : i32
    return %c0_i32, %c0_i32_0 : i32, i32
  }
  func.func @transform_16(%arg0: i32) -> (i32, i32) {
    %c0_i32 = arith.constant 0 : i32
    %c0_i32_0 = arith.constant 0 : i32
    %c0_i32_1 = arith.constant 0 : i32
    return %c0_i32, %c0_i32_0 : i32, i32
  }
  func.func @transform_17(%arg0: i32) -> (i32, i32) {
    %c0_i32 = arith.constant 0 : i32
    %c0_i32_0 = arith.constant 0 : i32
    %c0_i32_1 = arith.constant 0 : i32
    return %c0_i32, %c0_i32_0 : i32, i32
  }
  func.func @transform_18(%arg0: i32) -> (i32, i32) {
    %c0_i32 = arith.constant 0 : i32
    %c0_i32_0 = arith.constant 0 : i32
    %c0_i32_1 = arith.constant 0 : i32
    return %c0_i32, %c0_i32_0 : i32, i32
  }
  func.func @transform_19(%arg0: i32) -> (i32, i32, i32) {
    %c0_i32 = arith.constant 0 : i32
    %c0_i32_0 = arith.constant 0 : i32
    %c0_i32_1 = arith.constant 0 : i32
    return %arg0, %c0_i32, %c0_i32_0 : i32, i32, i32
  }
}

</mosaic_0001>

<bundles_post_ra>
// kernel: tpu_custom_call.1
= control target key start
LH: loop header
LB: loop body
LE: loop exit
PB: predicated region body
PF: predicated region fallthrough
CT: control target
= control target key end

     0   :  { %s4024_s0 = inlined_call_operand.vmem [shape: f32[2,8,32], index: 0, kind: input, shape index: {}]   ;;  %s4025_s1 = inlined_call_operand.vmem [shape: f32[2,12,32], index: 1, kind: input, shape index: {}]   ;;  %s4026_s2 = inlined_call_operand.vmem [shape: f32[1,32], index: 2, kind: input, shape index: {}]   ;;  %s4027_s3 = inlined_call_operand.vmem [shape: f32[1,32], index: 3, kind: input, shape index: {}]   ;;  %s4028_s4 = inlined_call_operand.hbm [shape: f32[1,32], index: 4, kind: input, shape index: {}]   ;;  %s4029_s5 = inlined_call_operand.hbm [shape: f32[1,32], index: 5, kind: input, shape index: {}]   ;;  %s4030_s6 = inlined_call_operand.hbm [shape: f32[1,32], index: 6, kind: input, shape index: {}]   ;;  %s4031_s7 = inlined_call_operand.hbm [shape: f32[1,32], index: 7, kind: input, shape index: {}]   ;;  %s4032_s8 = inlined_call_operand.vmem [shape: bf16[32,96], index: 8, kind: input, shape index: {}]   ;;  %s4033_s9 = inlined_call_operand.vmem [shape: bf16[32,32], index: 9, kind: input, shape index: {}]   ;;  %s4034_s10 = inlined_call_operand.vmem [shape: f32[1,32], index: 10, kind: input, shape index: {}]   ;;  %s4035_s11 = inlined_call_operand.vmem [shape: bf16[32,32], index: 11, kind: input, shape index: {}]   ;;  %s4036_s12 = inlined_call_operand.vmem [shape: bf16[32,64], index: 12, kind: input, shape index: {}]   ;;  %s4037_s13 = inlined_call_operand.vmem [shape: bf16[32,32], index: 13, kind: input, shape index: {}]   ;;  %s4038_s14 = inlined_call_operand.vmem [shape: f32[1,32], index: 14, kind: input, shape index: {}]   ;;  %s4039_s15 = inlined_call_operand.vmem [shape: bf16[32,64], index: 15, kind: input, shape index: {}]   ;;  %s4040_s16 = inlined_call_operand.vmem [shape: f32[1,64], index: 16, kind: input, shape index: {}]   ;;  %s4041_s17 = inlined_call_operand.vmem [shape: bf16[64,32], index: 17, kind: input, shape index: {}]   ;;  %s4042_s18 = inlined_call_operand.vmem [shape: f32[1,32], index: 18, kind: input, shape index: {}]   ;;  %s4043_s19 = inlined_call_operand.hbm [shape: f32[2,8,32], index: 19, kind: output, shape index: {}]  }
   0x1   :  { %4046 = sst [smem:[#allocation15_spill]] %s4024_s0 }
   0x2   :  { %4047 = sst [smem:[#allocation16_spill]] %s4025_s1 }
   0x3   :  { %4048 = sst [smem:[#allocation17_spill]] %s4026_s2 }
   0x4   :  { %4049 = sst [smem:[#allocation18_spill]] %s4027_s3 }
   0x5   :  { %24 = vsyncpa [#allocation3], 0 }
   0x6   :  { %25 = vsyncpa [#allocation6], 0 }
   0x7   :  { %26 = vsyncpa [#allocation9], 0 }
   0x8   :  { %27 = vsyncpa [#allocation4], 0  ;;  %s3345_s0 = smov [#allocation5]   ;;  %s3346_s20 = smov [#allocation2]  }
   0x9   :  { %s52_s30 = sshll.u32 %s3345_s0, 4  ;;  %s42_s21 = sshll.u32 %s3346_s20, 4  ;;  %s53_s30 = int_to_ptr.vmem [resolvable:$true] %s52_s30  ;;  %s43_s21 = int_to_ptr.vmem [resolvable:$true] %s42_s21 }
   0xa   :  { %s3227_s2 = scalar_lea.hbm %s4029_s5, 16 }
   0xb   :  { %p3228_p0 = scmp.ne.s32.totalorder %s4029_s5, %s3227_s2  ;;  %p3231_p1 = scmp.lt.u32.totalorder %s3227_s2, %s4029_s5 }
   0xd   :  { %p3233_p2 = pnand %p3231_p1, %p3228_p0 }
   0xf   :  { %3236 = shalt.err (!%p3233_p2)
}
  0x10   :  { %s3237_s26 = scalar_lea.vmem %s53_s30, 16  ;;  %s3241_s27 = scalar_lea.vmem %s53_s30, 32 }
  0x11   :  { %p3238_p3 = scmp.ne.s32.totalorder %s53_s30, %s3237_s26  ;;  %p3242_p4 = scmp.lt.s32.totalorder %s53_s30, %s53_s30 }
  0x12   :  { %p3243_p5 = scmp.lt.s32.totalorder %s3241_s27, %s3237_s26 }
  0x14   :  { %p3244_p6 = por %p3243_p5, %p3242_p4 }
  0x16   :  { %p3245_p7 = pnand %p3244_p6, %p3238_p3 }
  0x18   :  { %3248 = shalt.err (!%p3245_p7)
}
  0x19   :  { %55 = dma.hbm_to_vmem [thread:$0]  %s4029_s5, 16, %s53_s30, [#allocation6]  }
  0x1a   :  { %s3249_s1 = scalar_lea.hbm %s4028_s4, 16 }
  0x1b   :  { %p3250_p8 = scmp.ne.s32.totalorder %s4028_s4, %s3249_s1  ;;  %p3253_p9 = scmp.lt.u32.totalorder %s3249_s1, %s4028_s4 }
  0x1d   :  { %p3255_p10 = pnand %p3253_p9, %p3250_p8 }
  0x1f   :  { %3258 = shalt.err (!%p3255_p10)
}
  0x20   :  { %s3259_s25 = scalar_lea.vmem %s43_s21, 16  ;;  %s3263_s3 = scalar_lea.vmem %s43_s21, 32 }
  0x21   :  { %p3260_p11 = scmp.ne.s32.totalorder %s43_s21, %s3259_s25  ;;  %p3264_p12 = scmp.lt.s32.totalorder %s43_s21, %s43_s21 }
  0x22   :  { %p3265_p13 = scmp.lt.s32.totalorder %s3263_s3, %s3259_s25 }
  0x24   :  { %p3266_p0 = por %p3265_p13, %p3264_p12 }
  0x26   :  { %p3267_p1 = pnand %p3266_p0, %p3260_p11 }
  0x28   :  { %3270 = shalt.err (!%p3267_p1)
}
  0x29   :  { %45 = dma.hbm_to_vmem [thread:$0]  %s4028_s4, 16, %s43_s21, [#allocation3]  }
  0x2a   :  { %s3347_s26 = smov [#allocation7]   ;;  %s3348_s28 = smov [#allocation8]  }
  0x2b   :  { %s62_s27 = sshll.u32 %s3347_s26, 4  ;;  %s72_s29 = sshll.u32 %s3348_s28, 4  ;;  %s63_s27 = int_to_ptr.vmem [resolvable:$true] %s62_s27  ;;  %s73_s29 = int_to_ptr.vmem [resolvable:$true] %s72_s29 }
  0x2c   :  { %s3271_s1 = scalar_lea.hbm %s4030_s6, 16 }
  0x2d   :  { %p3272_p2 = scmp.ne.s32.totalorder %s4030_s6, %s3271_s1  ;;  %p3275_p3 = scmp.lt.u32.totalorder %s3271_s1, %s4030_s6 }
  0x2f   :  { %p3277_p4 = pnand %p3275_p3, %p3272_p2 }
  0x31   :  { %3280 = shalt.err (!%p3277_p4)
}
  0x32   :  { %s3281_s4 = scalar_lea.vmem %s63_s27, 16  ;;  %s3285_s21 = scalar_lea.vmem %s63_s27, 32 }
  0x33   :  { %p3282_p5 = scmp.ne.s32.totalorder %s63_s27, %s3281_s4  ;;  %p3286_p6 = scmp.lt.s32.totalorder %s63_s27, %s63_s27 }
  0x34   :  { %p3287_p7 = scmp.lt.s32.totalorder %s3285_s21, %s3281_s4 }
  0x36   :  { %p3288_p8 = por %p3287_p7, %p3286_p6 }
  0x38   :  { %p3289_p9 = pnand %p3288_p8, %p3282_p5 }
  0x3a   :  { %3292 = shalt.err (!%p3289_p9)
}
  0x3b   :  { %65 = dma.hbm_to_vmem [thread:$0]  %s4030_s6, 16, %s63_s27, [#allocation6]  }
  0x3c   :  { %s3293_s26 = scalar_lea.hbm %s4031_s7, 16 }
  0x3d   :  { %p3294_p10 = scmp.ne.s32.totalorder %s4031_s7, %s3293_s26  ;;  %p3297_p11 = scmp.lt.u32.totalorder %s3293_s26, %s4031_s7 }
  0x3f   :  { %p3299_p12 = pnand %p3297_p11, %p3294_p10 }
  0x41   :  { %3302 = shalt.err (!%p3299_p12)
}
  0x42   :  { %s3303_s22 = scalar_lea.vmem %s73_s29, 16  ;;  %s3307_s2 = scalar_lea.vmem %s73_s29, 32 }
  0x43   :  { %p3304_p13 = scmp.ne.s32.totalorder %s73_s29, %s3303_s22  ;;  %p3308_p0 = scmp.lt.s32.totalorder %s73_s29, %s73_s29 }
  0x44   :  { %p3309_p1 = scmp.lt.s32.totalorder %s3307_s2, %s3303_s22 }
  0x46   :  { %p3310_p2 = por %p3309_p1, %p3308_p0 }
  0x48   :  { %p3311_p3 = pnand %p3310_p2, %p3304_p13 }
  0x4a   :  { %3314 = shalt.err (!%p3311_p3)
}
  0x4b   :  { %75 = dma.hbm_to_vmem [thread:$0]  %s4031_s7, 16, %s73_s29, [#allocation9]  }
  0x4c   :  { %3337 = dma.done.wait [#allocation3], 16  }
  0x4d   :  { %3338 = vsyncadd [#allocation3], 4294967280 }
  0x4e   :  { %3339 = dma.done.wait [#allocation6], 32  }
  0x4f   :  { %3340 = vsyncadd [#allocation6], 4294967264 }
  0x50   :  { %3341 = dma.done.wait [#allocation9], 16  }
  0x51   :  { %3342 = vsyncadd [#allocation9], 4294967280  ;;  %vm133_vm0 = vcmask 261120   ;;  %s4050_s4 = sld [smem:[#allocation15_spill]]  ;;  %v3132_v14 = vld [vmem:[%s4032_s8] sm:$0xff]   ;;  %v3349_v15 = vmov 0.0  }
  0x52   :  { %2827 = vmatprep.subr.bf16.mxu1 %v3349_v15  ;;  %2841 = vmatprep.subr.bf16.mxu0 %v3349_v15  ;;  %v3133_v16 = vld [vmem:[%s4032_s8 + $0x8] sm:$0xff]   ;;  %vm3350_vm1 = vmmov 0   ;;  %s4051_s26 = sld [smem:[#allocation17_spill]]  ;;  %s4052_s20 = sld [smem:[#allocation18_spill]]  ;;  %vm251_vm2 = vcmask 64512   ;;  %vm375_vm3 = vcmask 1043456  }
  0x53   :  { %2828 = vmatpush3.bf16.msra.mxu1 %v3132_v14  ;;  %2831 = vmatprep.mubr.msk.bf16.mxu1 %vm3350_vm1, %v3349_v15  ;;  %s3351_s1 = smov 96   ;;  %s3352_s22 = smov 64   ;;  %vm1153_vm4 = vcmask 130048   ;;  %vm1156_vm5 = vcmask 195584   ;;  %vm1563_vm6 = vcmask 97280   ;;  %vm1593_vm7 = vcmask 1045504  }
  0x54   :  { %2829 = vmatprep.subr.bf16.mxu1 %v3349_v15  ;;  %2843 = vmatprep.mubr.msk.bf16.mxu0 %vm3350_vm1, %v3349_v15  ;;  %s3353_s2 = smov 88   ;;  %s3354_s6 = smov 120   ;;  %vm2587_vm8 = vcmask 523264  }
  0x55   :  { %s3355_s27 = smov 56   ;;  %s3356_s23 = smov 80  }
  0x56   :  { %s3357_s24 = smov 112   ;;  %s3359_s21 = smov 72  }
  0x57   :  { %v3519_v0 = vld [vmem:[%s4050_s4] sm:$0xff]  ;;  %v3524_v1 = vld [vmem:[%s4050_s4 + $0x8] sm:$0xff]  ;;  %2830 = vmatpush3.bf16.msra.mxu1 %v3133_v16  ;;  %s3358_s4 = smov 48   ;;  %s3360_s25 = smov 104  }
  0x58   :  { %v134_v2 = vsel %vm133_vm0, %v3519_v0, 0.0  ;;  %v137_v3 = vsel %vm133_vm0, %v3524_v1, 0.0  ;;  %2835 = vmatprep.subr.bf16.mxu1 %v3349_v15  ;;  %v2664_v25 = vld [vmem:[%s4051_s26] ss:$0 sm:$0xff]  ;;  %s3361_s7 = smov 40   ;;  %s3362_s29 = smov 8  }
  0x59   :  { %135 = vadd.xlane.f32.xlu0 %v134_v2  ;;  %v2665_v29 = vld [vmem:[%s4052_s20] ss:$0 sm:$0xff]  ;;  %s3363_s3 = smov 16   ;;  %s3364_s28 = smov 24  }
  0x5a   :  { %s4053_s5 = sld [smem:[#allocation16_spill]] }
  0x5d   :  { %138 = vadd.xlane.f32.xlu0 %v137_v3 }
  0xe6   :  { %v136_v4 = vpop.xlane.xlu0 %135 }
  0xe7   :  { %v141_v5 = vmul.f32 0.03125, %v136_v4 }
  0xe9   :  { %v143_v6 = vsub.f32 %v3519_v0, %v141_v5 }
  0xea   :  { %v139_v7 = vpop.xlane.xlu0 %138 }
  0xeb   :  { %v142_v8 = vmul.f32 0.03125, %v139_v7  ;;  %v145_v9 = vmul.f32 %v143_v6, %v143_v6 }
  0xed   :  { %v144_v10 = vsub.f32 %v3524_v1, %v142_v8  ;;  %v147_v11 = vsel %vm133_vm0, %v145_v9, 0.0 }
  0xee   :  { %148 = vadd.xlane.f32.xlu1 %v147_v11 }
  0xef   :  { %v146_v12 = vmul.f32 %v144_v10, %v144_v10 }
  0xf1   :  { %v150_v13 = vsel %vm133_vm0, %v146_v12, 0.0 }
  0xf2   :  { %151 = vadd.xlane.f32.xlu1 %v150_v13 }
 0x17b   :  { %v149_v17 = vpop.xlane.xlu1 %148 }
 0x17c   :  { %v153_v18 = vmul.f32 0.03125, %v149_v17 }
 0x17e   :  { %v155_v19 = vadd.f32 1e-05, %v153_v18 }
 0x17f   :  { %v152_v20 = vpop.xlane.xlu1 %151 }
 0x180   :  { %3151 = vrsqrt.f32 %v155_v19  ;;  %v154_v21 = vmul.f32 0.03125, %v152_v20 }
 0x182   :  { %v156_v22 = vadd.f32 1e-05, %v154_v21 }
 0x184   :  { %3153 = vrsqrt.f32 %v156_v22 }
 0x18a   :  { %v3152_v23 = vpop.eup %3151 }
 0x18b   :  { %v159_v24 = vmul.f32 %v3152_v23, %v143_v6 }
 0x18d   :  { %v167_v28 = vmul.f32 %v2664_v25, %v159_v24 }
 0x18e   :  { %v3154_v26 = vpop.eup %3153 }
 0x18f   :  { %v160_v27 = vmul.f32 %v3154_v26, %v144_v10  ;;  %v175_v31 = vadd.f32 %v2665_v29, %v167_v28 }
 0x191   :  { %v168_v30 = vmul.f32 %v2664_v25, %v160_v27 }
 0x193   :  { %v176_v32 = vadd.f32 %v2665_v29, %v168_v30 }
 0x195   :  { %v177_v33 = vpack.c.bf16 %v176_v32, %v175_v31 }
 0x197   :  { %2832 = vmatmul.mubr.msk.bf16.vlgmr.msra.gmra.mrb[0].mxu1 %vm133_vm0, %v177_v33 }
 0x198   :  { %2837 = vmatprep.mubr.msk.bf16.mxu1 %vm3350_vm1, %v3349_v15 }
 0x26a   :  { %v231_v34 = vpop.f32.mrb[0].mxu1 }
 0x26b   :  { %v3557_v35 = vpack.c.bf16 %v231_v34, %v231_v34  ;;  %v2833_v36 = vpop.f32.mrb[1].mxu1 }
 0x26c   :  { %v234_v37 = vpop.f32.mrb[2].mxu1 }
 0x26d   :  { %v3559_v38 = vpack.c.bf16 %v234_v37, %v234_v37  ;;  %249 = vrot.lane.b32.xlu0 %v3557_v35, %s3351_s1  ;;  %v2834_v39 = vpop.f32.mrb[3].mxu1 }
 0x26f   :  { %298 = vrot.lane.b32.xlu1 %v3559_v38, %s3351_s1 }
 0x2df   :  { %v250_v40 = vpop.permute.xlu0 %249 }
 0x2e0   :  { %v256_v41 = vsel %vm251_vm2, %v250_v40, 0 }
 0x2e1   :  { %2836 = vmatpush3.bf16.xpose.msra.mxu1 %v256_v41  ;;  %v299_v42 = vpop.permute.xlu1 %298 }
 0x2e2   :  { %v304_v43 = vsel %vm251_vm2, %v299_v42, 0  ;;  %2847 = vmatprep.subr.bf16.mxu1 %v3349_v15 }
 0x2e3   :  { %2842 = vmatpush3.bf16.xpose.msra.mxu0 %v304_v43 }
 0x2e4   :  { %2853 = vmatprep.subr.bf16.mxu0 %v3349_v15 }
 0x2e8   :  { %2838 = vmatmul.mubr.msk.bf16.vlgmr.msra.gmra.mrb[4].mxu1 %vm251_vm2, %v3557_v35 }
 0x2e9   :  { %2849 = vmatprep.mubr.msk.bf16.mxu1 %vm3350_vm1, %v3349_v15 }
 0x2ea   :  { %2844 = vmatmul.mubr.msk.bf16.vlgmr.msra.gmra.mrb[0].mxu0 %vm251_vm2, %v3559_v38 }
 0x2eb   :  { %2855 = vmatprep.mubr.msk.bf16.mxu0 %vm3350_vm1, %v3349_v15 }
 0x3bb   :  { %v292_v44 = vpop.f32.mrb[4].mxu1 }
 0x3bc   :  { %v2839_v45 = vpop.f32.mrb[5].mxu1  ;;  %v346_v46 = vsel %vm251_vm2, %v292_v44, -inf }
 0x3bd   :  { %v340_v47 = vpop.f32.mrb[0].mxu0  ;;  %347 = vmax.xlane.f32.xlu1 %v346_v46  ;;  %v295_v48 = vpop.f32.mrb[6].mxu1 }
 0x3be   :  { %v2840_v49 = vpop.f32.mrb[7].mxu1  ;;  %v2845_v50 = vpop.f32.mrb[1].mxu0  ;;  %v349_v51 = vsel %vm251_vm2, %v340_v47, -inf }
 0x3bf   :  { %350 = vmax.xlane.f32.xlu0 %v349_v51  ;;  %v343_v52 = vpop.f32.mrb[2].mxu0 }
 0x3c0   :  { %v2846_v53 = vpop.f32.mrb[3].mxu0 }
 0x3ce   :  { %419 = vrot.lane.b32.xlu1 %v3559_v38, %s3352_s22 }
 0x3d2   :  { %469 = vrot.lane.b32.xlu1 %v3557_v35, %s3353_s2 }
 0x44a   :  { %v348_v54 = vpop.xlane.xlu1 %347 }
 0x44b   :  { %v352_v55 = vsub.f32 %v292_v44, %v348_v54 }
 0x44c   :  { %v351_v56 = vpop.xlane.xlu0 %350 }
 0x44d   :  { %v354_v57 = vmul.f32 1.442695, %v352_v55  ;;  %v353_v58 = vsub.f32 %v340_v47, %v351_v56 }
 0x44e   :  { %v420_v59 = vpop.permute.xlu1 %419 }
 0x44f   :  { %3155 = vpow2.f32 %v354_v57  ;;  %v356_v60 = vmul.f32 1.442695, %v353_v58  ;;  %v425_v61 = vsel %vm375_vm3, %v420_v59, 0 }
 0x450   :  { %2854 = vmatpush3.bf16.msra.mxu0 %v425_v61 }
 0x451   :  { %3157 = vpow2.f32 %v356_v60  ;;  %2865 = vmatprep.subr.bf16.mxu0 %v3349_v15 }
 0x452   :  { %v470_v4 = vpop.permute.xlu1 %469 }
 0x453   :  { %v475_v16 = vsel %vm251_vm2, %v470_v4, 0 }
 0x459   :  { %v3156_v62 = vpop.eup %3155 }
 0x45a   :  { %v358_v63 = vsel %vm251_vm2, %v3156_v62, 0.0 }
 0x45b   :  { %v3158_v2 = vpop.eup %3157  ;;  %359 = vadd.xlane.f32.xlu0 %v358_v63 }
 0x45c   :  { %v361_v3 = vsel %vm251_vm2, %v3158_v2, 0.0 }
 0x45d   :  { %362 = vadd.xlane.f32.xlu1 %v361_v3 }
 0x46e   :  { %519 = vrot.lane.b32.xlu1 %v3559_v38, %s3353_s2 }
 0x471   :  { %370 = vrot.lane.b32.xlu0 %v3557_v35, %s3352_s22 }
 0x472   :  { %517 = vrot.lane.b32.xlu1 %v3559_v38, %s3354_s6 }
 0x475   :  { %467 = vrot.lane.b32.xlu0 %v3557_v35, %s3354_s6 }
 0x4e8   :  { %v360_v5 = vpop.xlane.xlu0 %359 }
 0x4e9   :  { %3159 = vrcp.f32 %v360_v5 }
 0x4ea   :  { %v363_v6 = vpop.xlane.xlu1 %362 }
 0x4eb   :  { %3161 = vrcp.f32 %v363_v6 }
 0x4ec   :  { %v371_v7 = vpop.permute.xlu0 %370 }
 0x4ed   :  { %v377_v8 = vsel %vm375_vm3, %v371_v7, 0 }
 0x4ee   :  { %2848 = vmatpush3.bf16.msra.mxu1 %v377_v8  ;;  %v520_v14 = vpop.permute.xlu1 %519 }
 0x4ef   :  { %2859 = vmatprep.subr.bf16.mxu1 %v3349_v15  ;;  %v525_v18 = vsel %vm251_vm2, %v520_v14, 0 }
 0x4f0   :  { %v468_v19 = vpop.permute.xlu0 %467 }
 0x4f2   :  { %v518_v20 = vpop.permute.xlu1 %517 }
 0x4f3   :  { %v3160_v9 = vpop.eup %3159 }
 0x4f4   :  { %v366_v10 = vmul.f32 %v3160_v9, %v3156_v62 }
 0x4f5   :  { %v3162_v11 = vpop.eup %3161 }
 0x4f6   :  { %v367_v12 = vmul.f32 %v3162_v11, %v3158_v2  ;;  %v368_v13 = vpack.c.bf16 %v366_v10, %v366_v10 }
 0x4f8   :  { %2850 = vmatmul.mubr.msk.bf16.vlgmr.msra.gmra.mrb[8].mxu1 %vm251_vm2, %v368_v13  ;;  %v369_v17 = vpack.c.bf16 %v367_v12, %v367_v12 }
 0x4f9   :  { %2860 = vmatpush3.bf16.xpose.msra.mxu1 %v475_v16  ;;  %2861 = vmatprep.mubr.msk.bf16.mxu1 %vm3350_vm1, %v3349_v15 }
 0x4fa   :  { %2856 = vmatmul.mubr.msk.bf16.vlgmr.msra.gmra.mrb[4].mxu0 %vm251_vm2, %v369_v17  ;;  %2871 = vmatprep.subr.bf16.mxu1 %v3349_v15 }
 0x4fb   :  { %2866 = vmatpush3.bf16.xpose.msra.mxu0 %v525_v18  ;;  %2867 = vmatprep.mubr.msk.bf16.mxu0 %vm3350_vm1, %v3349_v15 }
 0x4fc   :  { %2877 = vmatprep.subr.bf16.mxu0 %v3349_v15 }
 0x500   :  { %2862 = vmatmul.mubr.msk.bf16.vlgmr.msra.gmra.mrb[12].mxu1 %vm251_vm2, %v468_v19 }
 0x501   :  { %2873 = vmatprep.mubr.msk.bf16.mxu1 %vm3350_vm1, %v3349_v15 }
 0x502   :  { %2868 = vmatmul.mubr.msk.bf16.vlgmr.msra.gmra.mrb[8].mxu0 %vm251_vm2, %v518_v20 }
 0x503   :  { %2879 = vmatprep.mubr.msk.bf16.mxu0 %vm3350_vm1, %v3349_v15 }
 0x5cb   :  { %v3611_v21 = vpop.f32.mrb[8].mxu1 }
 0x5cc   :  { %v2851_v22 = vpop.f32.mrb[9].mxu1 }
 0x5cd   :  { %v416_v23 = vpop.f32.mrb[10].mxu1  ;;  %v3613_v24 = vpop.f32.mrb[4].mxu0 }
 0x5ce   :  { %v2852_v25 = vpop.f32.mrb[11].mxu1  ;;  %v2857_v26 = vpop.f32.mrb[5].mxu0 }
 0x5cf   :  { %v464_v27 = vpop.f32.mrb[6].mxu0 }
 0x5d0   :  { %v2858_v28 = vpop.f32.mrb[7].mxu0 }
 0x5d3   :  { %v511_v29 = vpop.f32.mrb[12].mxu1 }
 0x5d4   :  { %v2863_v30 = vpop.f32.mrb[13].mxu1  ;;  %v567_v31 = vsel %vm251_vm2, %v511_v29, -inf }
 0x5d5   :  { %v561_v32 = vpop.f32.mrb[8].mxu0  ;;  %568 = vmax.xlane.f32.xlu0 %v567_v31  ;;  %v514_v33 = vpop.f32.mrb[14].mxu1 }
 0x5d6   :  { %v2864_v34 = vpop.f32.mrb[15].mxu1  ;;  %v2869_v36 = vpop.f32.mrb[9].mxu0  ;;  %v570_v37 = vsel %vm251_vm2, %v561_v32, -inf }
 0x5d7   :  { %571 = vmax.xlane.f32.xlu1 %v570_v37  ;;  %v564_v39 = vpop.f32.mrb[10].mxu0 }
 0x5d8   :  { %v2870_v40 = vpop.f32.mrb[11].mxu0 }
 0x5e8   :  { %639 = vrot.lane.b32.xlu1 %v3559_v38, %s3355_s27 }
 0x5ec   :  { %689 = vrot.lane.b32.xlu1 %v3557_v35, %s3356_s23 }
 0x5f0   :  { %739 = vrot.lane.b32.xlu1 %v3559_v38, %s3356_s23 }
 0x5f4   :  { %737 = vrot.lane.b32.xlu1 %v3559_v38, %s3357_s24 }
 0x662   :  { %v569_v41 = vpop.xlane.xlu0 %568 }
 0x663   :  { %v573_v42 = vsub.f32 %v511_v29, %v569_v41 }
 0x664   :  { %v572_v43 = vpop.xlane.xlu1 %571 }
 0x665   :  { %v575_v44 = vmul.f32 1.442695, %v573_v42  ;;  %v574_v45 = vsub.f32 %v561_v32, %v572_v43 }
 0x667   :  { %3163 = vpow2.f32 %v575_v44  ;;  %v577_v46 = vmul.f32 1.442695, %v574_v45 }
 0x668   :  { %v640_v47 = vpop.permute.xlu1 %639 }
 0x669   :  { %3165 = vpow2.f32 %v577_v46  ;;  %v645_v48 = vsel %vm375_vm3, %v640_v47, 0 }
 0x66a   :  { %2878 = vmatpush3.bf16.msra.mxu0 %v645_v48 }
 0x66b   :  { %2889 = vmatprep.subr.bf16.mxu0 %v3349_v15 }
 0x66c   :  { %v690_v58 = vpop.permute.xlu1 %689 }
 0x66d   :  { %v695_v2 = vsel %vm251_vm2, %v690_v58, 0 }
 0x670   :  { %v740_v63 = vpop.permute.xlu1 %739 }
 0x671   :  { %v3164_v49 = vpop.eup %3163  ;;  %v745_v4 = vsel %vm251_vm2, %v740_v63, 0 }
 0x672   :  { %v579_v50 = vsel %vm251_vm2, %v3164_v49, 0.0 }
 0x673   :  { %v3166_v51 = vpop.eup %3165  ;;  %580 = vadd.xlane.f32.xlu0 %v579_v50 }
 0x674   :  { %v582_v52 = vsel %vm251_vm2, %v3166_v51, 0.0  ;;  %v738_v6 = vpop.permute.xlu1 %737 }
 0x677   :  { %583 = vadd.xlane.f32.xlu0 %v582_v52 }
 0x68d   :  { %591 = vrot.lane.b32.xlu0 %v3557_v35, %s3355_s27 }
 0x691   :  { %687 = vrot.lane.b32.xlu0 %v3557_v35, %s3357_s24 }
 0x700   :  { %v581_v53 = vpop.xlane.xlu0 %580 }
 0x701   :  { %3167 = vrcp.f32 %v581_v53 }
 0x704   :  { %v584_v54 = vpop.xlane.xlu0 %583 }
 0x705   :  { %3169 = vrcp.f32 %v584_v54 }
 0x708   :  { %v592_v55 = vpop.permute.xlu0 %591 }
 0x709   :  { %v597_v56 = vsel %vm375_vm3, %v592_v55, 0 }
 0x70a   :  { %2872 = vmatpush3.bf16.msra.mxu1 %v597_v56 }
 0x70b   :  { %v3168_v57 = vpop.eup %3167  ;;  %2883 = vmatprep.subr.bf16.mxu1 %v3349_v15 }
 0x70c   :  { %v587_v59 = vmul.f32 %v3168_v57, %v3164_v49  ;;  %v688_v5 = vpop.permute.xlu0 %687 }
 0x70e   :  { %v589_v60 = vpack.c.bf16 %v587_v59, %v587_v59 }
 0x70f   :  { %v3170_v61 = vpop.eup %3169 }
 0x710   :  { %v588_v62 = vmul.f32 %v3170_v61, %v3166_v51  ;;  %2874 = vmatmul.mubr.msk.bf16.vlgmr.msra.gmra.mrb[16].mxu1 %vm251_vm2, %v589_v60 }
 0x711   :  { %2885 = vmatprep.mubr.msk.bf16.mxu1 %vm3350_vm1, %v3349_v15 }
 0x712   :  { %v590_v3 = vpack.c.bf16 %v588_v62, %v588_v62 }
 0x713   :  { %2884 = vmatpush3.bf16.xpose.msra.mxu1 %v695_v2 }
 0x714   :  { %2880 = vmatmul.mubr.msk.bf16.vlgmr.msra.gmra.mrb[12].mxu0 %vm251_vm2, %v590_v3  ;;  %2895 = vmatprep.subr.bf16.mxu1 %v3349_v15 }
 0x715   :  { %2890 = vmatpush3.bf16.xpose.msra.mxu0 %v745_v4  ;;  %2891 = vmatprep.mubr.msk.bf16.mxu0 %vm3350_vm1, %v3349_v15 }
 0x716   :  { %2901 = vmatprep.subr.bf16.mxu0 %v3349_v15 }
 0x71a   :  { %2886 = vmatmul.mubr.msk.bf16.vlgmr.msra.gmra.mrb[20].mxu1 %vm251_vm2, %v688_v5 }
 0x71b   :  { %2897 = vmatprep.mubr.msk.bf16.mxu1 %vm3350_vm1, %v3349_v15 }
 0x71c   :  { %2892 = vmatmul.mubr.msk.bf16.vlgmr.msra.gmra.mrb[16].mxu0 %vm251_vm2, %v738_v6 }
 0x71d   :  { %2903 = vmatprep.mubr.msk.bf16.mxu0 %vm3350_vm1, %v3349_v15 }
 0x7e3   :  { %v3649_v7 = vpop.f32.mrb[16].mxu1 }
 0x7e4   :  { %v2875_v8 = vpop.f32.mrb[17].mxu1 }
 0x7e5   :  { %v636_v9 = vpop.f32.mrb[18].mxu1 }
 0x7e6   :  { %v2876_v10 = vpop.f32.mrb[19].mxu1 }
 0x7e7   :  { %v3651_v11 = vpop.f32.mrb[12].mxu0 }
 0x7e8   :  { %v3102_v12 = vpack.i.bf16 %v3651_v11, %v3649_v7  ;;  %v2881_v13 = vpop.f32.mrb[13].mxu0 }
 0x7e9   :  { %v684_v14 = vpop.f32.mrb[14].mxu0 }
 0x7ea   :  { %v2882_v16 = vpop.f32.mrb[15].mxu0 }
 0x7ed   :  { %v731_v17 = vpop.f32.mrb[20].mxu1 }
 0x7ee   :  { %v2887_v18 = vpop.f32.mrb[21].mxu1  ;;  %v787_v19 = vsel %vm251_vm2, %v731_v17, -inf }
 0x7ef   :  { %v781_v20 = vpop.f32.mrb[16].mxu0  ;;  %788 = vmax.xlane.f32.xlu0 %v787_v19  ;;  %v734_v22 = vpop.f32.mrb[22].mxu1 }
 0x7f0   :  { %v2888_v23 = vpop.f32.mrb[23].mxu1  ;;  %v2893_v25 = vpop.f32.mrb[17].mxu0  ;;  %v790_v26 = vsel %vm251_vm2, %v781_v20, -inf }
 0x7f1   :  { %791 = vmax.xlane.f32.xlu1 %v790_v26  ;;  %v784_v27 = vpop.f32.mrb[18].mxu0 }
 0x7f2   :  { %v2894_v28 = vpop.f32.mrb[19].mxu0 }
 0x802   :  { %859 = vrot.lane.b32.xlu1 %v3559_v38, %s3358_s4 }
 0x806   :  { %909 = vrot.lane.b32.xlu1 %v3557_v35, %s3359_s21 }
 0x80a   :  { %959 = vrot.lane.b32.xlu1 %v3559_v38, %s3359_s21 }
 0x80e   :  { %957 = vrot.lane.b32.xlu1 %v3559_v38, %s3360_s25 }
 0x87c   :  { %v789_v29 = vpop.xlane.xlu0 %788 }
 0x87d   :  { %v793_v30 = vsub.f32 %v731_v17, %v789_v29 }
 0x87e   :  { %v792_v31 = vpop.xlane.xlu1 %791 }
 0x87f   :  { %v795_v32 = vmul.f32 1.442695, %v793_v30  ;;  %v794_v33 = vsub.f32 %v781_v20, %v792_v31 }
 0x881   :  { %3171 = vpow2.f32 %v795_v32  ;;  %v797_v34 = vmul.f32 1.442695, %v794_v33 }
 0x882   :  { %v860_v36 = vpop.permute.xlu1 %859 }
 0x883   :  { %3173 = vpow2.f32 %v797_v34  ;;  %v865_v37 = vsel %vm375_vm3, %v860_v36, 0 }
 0x884   :  { %2902 = vmatpush3.bf16.msra.mxu0 %v865_v37 }
 0x885   :  { %2913 = vmatprep.subr.bf16.mxu0 %v3349_v15 }
 0x886   :  { %v910_v48 = vpop.permute.xlu1 %909 }
 0x887   :  { %v915_v54 = vsel %vm251_vm2, %v910_v48, 0 }
 0x88a   :  { %v960_v53 = vpop.permute.xlu1 %959 }
 0x88b   :  { %v3172_v39 = vpop.eup %3171  ;;  %v965_v56 = vsel %vm251_vm2, %v960_v53, 0 }
 0x88c   :  { %v799_v40 = vsel %vm251_vm2, %v3172_v39, 0.0 }
 0x88d   :  { %v3174_v41 = vpop.eup %3173  ;;  %800 = vadd.xlane.f32.xlu0 %v799_v40 }
 0x88e   :  { %v802_v42 = vsel %vm251_vm2, %v3174_v41, 0.0  ;;  %v958_v58 = vpop.permute.xlu1 %957 }
 0x891   :  { %803 = vadd.xlane.f32.xlu0 %v802_v42  ;;  %v3135_v42 = vld [vmem:[%s4033_s9 + $0x8] sm:$0xff]  }
 0x8a7   :  { %811 = vrot.lane.b32.xlu0 %v3557_v35, %s3358_s4 }
 0x8ab   :  { %907 = vrot.lane.b32.xlu0 %v3557_v35, %s3360_s25 }
 0x91a   :  { %v801_v43 = vpop.xlane.xlu0 %800 }
 0x91b   :  { %3175 = vrcp.f32 %v801_v43 }
 0x91e   :  { %v804_v44 = vpop.xlane.xlu0 %803 }
 0x91f   :  { %3177 = vrcp.f32 %v804_v44 }
 0x922   :  { %v812_v45 = vpop.permute.xlu0 %811 }
 0x923   :  { %v817_v46 = vsel %vm375_vm3, %v812_v45, 0 }
 0x924   :  { %2896 = vmatpush3.bf16.msra.mxu1 %v817_v46 }
 0x925   :  { %v3176_v47 = vpop.eup %3175  ;;  %2907 = vmatprep.subr.bf16.mxu1 %v3349_v15 }
 0x926   :  { %v807_v49 = vmul.f32 %v3176_v47, %v3172_v39  ;;  %v908_v57 = vpop.permute.xlu0 %907 }
 0x928   :  { %v809_v50 = vpack.c.bf16 %v807_v49, %v807_v49 }
 0x929   :  { %v3178_v51 = vpop.eup %3177 }
 0x92a   :  { %v808_v52 = vmul.f32 %v3178_v51, %v3174_v41  ;;  %2898 = vmatmul.mubr.msk.bf16.vlgmr.msra.gmra.mrb[24].mxu1 %vm251_vm2, %v809_v50  ;;  %v3134_v41 = vld [vmem:[%s4033_s9] sm:$0xff]  }
 0x92b   :  { %2909 = vmatprep.mubr.msk.bf16.mxu1 %vm3350_vm1, %v3349_v15 }
 0x92c   :  { %v810_v55 = vpack.c.bf16 %v808_v52, %v808_v52 }
 0x92d   :  { %2908 = vmatpush3.bf16.xpose.msra.mxu1 %v915_v54 }
 0x92e   :  { %2904 = vmatmul.mubr.msk.bf16.vlgmr.msra.gmra.mrb[20].mxu0 %vm251_vm2, %v810_v55  ;;  %2919 = vmatprep.subr.bf16.mxu1 %v3349_v15 }
 0x92f   :  { %2914 = vmatpush3.bf16.xpose.msra.mxu0 %v965_v56  ;;  %2915 = vmatprep.mubr.msk.bf16.mxu0 %vm3350_vm1, %v3349_v15 }
 0x930   :  { %2925 = vmatprep.subr.bf16.mxu0 %v3349_v15 }
 0x934   :  { %2910 = vmatmul.mubr.msk.bf16.vlgmr.msra.gmra.mrb[28].mxu1 %vm251_vm2, %v908_v57 }
 0x935   :  { %2921 = vmatprep.mubr.msk.bf16.mxu1 %vm3350_vm1, %v3349_v15 }
 0x936   :  { %2916 = vmatmul.mubr.msk.bf16.vlgmr.msra.gmra.mrb[24].mxu0 %vm251_vm2, %v958_v58 }
 0x937   :  { %2927 = vmatprep.mubr.msk.bf16.mxu0 %vm3350_vm1, %v3349_v15 }
 0x9fd   :  { %v853_v59 = vpop.f32.mrb[24].mxu1 }
 0x9fe   :  { %v2899_v60 = vpop.f32.mrb[25].mxu1 }
 0x9ff   :  { %v856_v61 = vpop.f32.mrb[26].mxu1 }
 0xa00   :  { %v2900_v62 = vpop.f32.mrb[27].mxu1 }
 0xa01   :  { %v901_v63 = vpop.f32.mrb[20].mxu0 }
 0xa02   :  { %v3107_v2 = vpack.i.bf16 %v901_v63, %v853_v59  ;;  %v2905_v3 = vpop.f32.mrb[21].mxu0 }
 0xa03   :  { %v904_v4 = vpop.f32.mrb[22].mxu0 }
 0xa04   :  { %v2906_v5 = vpop.f32.mrb[23].mxu0 }
 0xa07   :  { %v951_v6 = vpop.f32.mrb[28].mxu1 }
 0xa08   :  { %v2911_v8 = vpop.f32.mrb[29].mxu1  ;;  %v1007_v9 = vsel %vm251_vm2, %v951_v6, -inf }
 0xa09   :  { %v1001_v10 = vpop.f32.mrb[24].mxu0  ;;  %1008 = vmax.xlane.f32.xlu0 %v1007_v9  ;;  %v954_v13 = vpop.f32.mrb[30].mxu1 }
 0xa0a   :  { %v2912_v14 = vpop.f32.mrb[31].mxu1  ;;  %v2917_v16 = vpop.f32.mrb[25].mxu0  ;;  %v1010_v17 = vsel %vm251_vm2, %v1001_v10, -inf }
 0xa0b   :  { %1011 = vmax.xlane.f32.xlu1 %v1010_v17  ;;  %v1004_v18 = vpop.f32.mrb[26].mxu0 }
 0xa0c   :  { %v2918_v19 = vpop.f32.mrb[27].mxu0 }
 0xa0d   :  { %v3136_v19 = vld [vmem:[%s4036_s12] sm:$0xff]  }
 0xa1c   :  { %1079 = vrot.lane.b32.xlu1 %v3559_v38, %s3361_s7 }
 0xa20   :  { %3103 = vrot.lane.b32.xlu1 %v3102_v12, %s3362_s29 }
 0xa24   :  { %3108 = vrot.lane.b32.xlu1 %v3107_v2, %s3363_s3 }
 0xa96   :  { %v1009_v20 = vpop.xlane.xlu0 %1008 }
 0xa97   :  { %v1013_v22 = vsub.f32 %v951_v6, %v1009_v20  ;;  %v114_v20 = vld [vmem:[%s4053_s5 + $0x8] sm:$0xf] }
 0xa98   :  { %v1012_v23 = vpop.xlane.xlu1 %1011 }
 0xa99   :  { %v1015_v25 = vmul.f32 1.442695, %v1013_v22  ;;  %v1014_v26 = vsub.f32 %v1001_v10, %v1012_v23  ;;  %v115_v22 = vld [vmem:[%s4053_s5 + $0x10] sm:$0xff] }
 0xa9b   :  { %3179 = vpow2.f32 %v1015_v25  ;;  %v1017_v27 = vmul.f32 1.442695, %v1014_v26  ;;  %v116_v25 = vld [vmem:[%s4053_s5 + $0x18] sm:$0xf]  ;;  %v122_v26 = vcombine.high %v115_v22, %v115_v22 }
 0xa9c   :  { %v1080_v28 = vpop.permute.xlu1 %1079 }
 0xa9d   :  { %3181 = vpow2.f32 %v1017_v27  ;;  %v1085_v38 = vsel %vm375_vm3, %v1080_v28, 0  ;;  %v124_v27 = vcombine.low %v114_v20, %v115_v22  ;;  %v2692_v22 = vld [vmem:[#allocation5] ss:$0 sm:$0xff] }
 0xa9e   :  { %2926 = vmatpush3.bf16.msra.mxu0 %v1085_v38  ;;  %v125_v38 = vcombine.low %v122_v26, %v116_v25 }
 0xa9f   :  { %2939 = vmatprep.subr.bf16.mxu0 %v3349_v15 }
 0xaa0   :  { %v3104_v52 = vpop.permute.xlu1 %3103 }
 0xaa1   :  { %v3106_v54 = vunpack.i.h.bf16 %v3104_v52  ;;  %v3105_v55 = vunpack.i.l.bf16 %v3104_v52 }
 0xaa3   :  { %v1152_v59 = vsel %vm251_vm2, %v3613_v24, %v3106_v54  ;;  %v1151_v60 = vsel %vm251_vm2, %v3611_v21, %v3105_v55  ;;  %v2687_v24 = vld [vmem:[%s4034_s10] ss:$0 sm:$0xff] }
 0xaa4   :  { %v3109_v53 = vpop.permute.xlu1 %3108 }
 0xaa5   :  { %v3180_v29 = vpop.eup %3179  ;;  %v3111_v56 = vunpack.i.h.bf16 %v3109_v53  ;;  %v3110_v57 = vunpack.i.l.bf16 %v3109_v53 }
 0xaa6   :  { %v1019_v7 = vsel %vm251_vm2, %v3180_v29, 0.0 }
 0xaa7   :  { %v3182_v11 = vpop.eup %3181  ;;  %1020 = vadd.xlane.f32.xlu0 %v1019_v7  ;;  %v1155_v63 = vsel %vm1153_vm4, %v1152_v59, %v3111_v56  ;;  %v1154_v2 = vsel %vm1153_vm4, %v1151_v60, %v3110_v57  ;;  %v130_v7 = vpack.c.bf16 %v125_v38, %v125_v38 }
 0xaa8   :  { %v1022_v12 = vsel %vm251_vm2, %v3182_v11, 0.0 }
 0xaab   :  { %1023 = vadd.xlane.f32.xlu0 %v1022_v12 }
 0xac1   :  { %1031 = vrot.lane.b32.xlu0 %v3557_v35, %s3361_s7 }
 0xb34   :  { %v1021_v30 = vpop.xlane.xlu0 %1020 }
 0xb35   :  { %3183 = vrcp.f32 %v1021_v30 }
 0xb38   :  { %v1024_v31 = vpop.xlane.xlu0 %1023 }
 0xb39   :  { %3185 = vrcp.f32 %v1024_v31 }
 0xb3c   :  { %v1032_v32 = vpop.permute.xlu0 %1031 }
 0xb3d   :  { %v1037_v33 = vsel %vm375_vm3, %v1032_v32, 0 }
 0xb3e   :  { %2920 = vmatpush3.bf16.msra.mxu1 %v1037_v33 }
 0xb3f   :  { %v3184_v34 = vpop.eup %3183  ;;  %2931 = vmatprep.subr.bf16.mxu1 %v3349_v15 }
 0xb40   :  { %v1027_v36 = vmul.f32 %v3184_v34, %v3180_v29 }
 0xb42   :  { %v1029_v37 = vpack.c.bf16 %v1027_v36, %v1027_v36 }
 0xb43   :  { %v3186_v39 = vpop.eup %3185 }
 0xb44   :  { %v1028_v40 = vmul.f32 %v3186_v39, %v3182_v11  ;;  %2922 = vmatmul.mubr.msk.bf16.vlgmr.msra.gmra.mrb[32].mxu1 %vm251_vm2, %v1029_v37 }
 0xb45   :  { %2935 = vmatprep.mubr.msk.bf16.mxu1 %vm3350_vm1, %v3349_v15  ;;  %2932 = vmatpush3.bf16.msra.mxu1 %v3134_v41  ;;  %v3365_v41 = vmov 1983009808  }
 0xb46   :  { %v1030_v35 = vpack.c.bf16 %v1028_v40, %v1028_v40  ;;  %2933 = vmatprep.subr.bf16.mxu1 %v3349_v15  ;;  %v3141_v40 = vld [vmem:[%s4035_s11] sm:$0xff]  }
 0xb48   :  { %2928 = vmatmul.mubr.msk.bf16.vlgmr.msra.gmra.mrb[28].mxu0 %vm251_vm2, %v1030_v35  ;;  %v3142_v35 = vld [vmem:[%s4035_s11 + $0x8] sm:$0xff]  }
 0xb49   :  { %2943 = vmatprep.mubr.msk.bf16.mxu0 %vm3350_vm1, %v3349_v15  ;;  %2934 = vmatpush3.bf16.msra.mxu1 %v3135_v42  ;;  %v1416_v42 = vunpack.c.l.s4 %v3365_v41 }
 0xb4a   :  { %2947 = vmatprep.subr.bf16.mxu1 %v3136_v19  ;;  %2940 = vmatpush3.bf16.msra.mxu0 %v3141_v40 }
 0xb4b   :  { %2941 = vmatprep.subr.bf16.mxu0 %v3349_v15 }
 0xb4e   :  { %2942 = vmatpush3.bf16.msra.mxu0 %v3142_v35 }
 0xb4f   :  { %2955 = vmatprep.subr.bf16.mxu0 %v3349_v15 }
 0xc17   :  { %v1073_v43 = vpop.f32.mrb[32].mxu1 }
 0xc18   :  { %v2923_v44 = vpop.f32.mrb[33].mxu1 }
 0xc19   :  { %v1076_v45 = vpop.f32.mrb[34].mxu1  ;;  %v1417_v44 = vunpack.c.0.s8 %v1416_v42 }
 0xc1a   :  { %v2924_v46 = vpop.f32.mrb[35].mxu1 }
 0xc1b   :  { %v1121_v47 = vpop.f32.mrb[28].mxu0 }
 0xc1c   :  { %v3112_v48 = vpack.i.bf16 %v1121_v47, %v1073_v43  ;;  %v2929_v49 = vpop.f32.mrb[29].mxu0  ;;  %v1418_v43 = vlaneseq }
 0xc1d   :  { %v1124_v50 = vpop.f32.mrb[30].mxu0 }
 0xc1e   :  { %v2930_v51 = vpop.f32.mrb[31].mxu0  ;;  %3113 = vrot.lane.b32.xlu0 %v3112_v48, %s3364_s28  ;;  %v1419_v45 = vshrl.u32 %v1418_v43, 7 }
 0xc20   :  { %v1420_v48 = vsub.s32 %v1417_v44, %v1419_v45 }
 0xc90   :  { %v3114_v58 = vpop.permute.xlu0 %3113 }
 0xc91   :  { %v3116_v61 = vunpack.i.h.bf16 %v3114_v58  ;;  %v3115_v62 = vunpack.i.l.bf16 %v3114_v58 }
 0xc93   :  { %v1158_v3 = vsel %vm1156_vm5, %v1155_v63, %v3116_v61  ;;  %v1157_v4 = vsel %vm1156_vm5, %v1154_v2, %v3115_v62 }
 0xc94   :  { %v1159_v5 = vpack.c.bf16 %v1158_v3, %v1157_v4 }
 0xc96   :  { %2936 = vmatmul.mubr.msk.bf16.vlgmr.msra.gmra.mrb[36].mxu1 %vm133_vm0, %v1159_v5 }
 0xc97   :  { %2948 = vmatpush3.bf16.msra.mxu1 %v3136_v19  ;;  %v2691_v19 = vld [vmem:[#allocation2] ss:$0 sm:$0xff] }
 0xd69   :  { %v1215_v6 = vpop.f32.mrb[36].mxu1 }
 0xd6a   :  { %v1216_v8 = vadd.f32 %v2687_v24, %v1215_v6  ;;  %v2937_v21 = vpop.f32.mrb[37].mxu1 }
 0xd6b   :  { %v1218_v9 = vpop.f32.mrb[38].mxu1 }
 0xd6c   :  { %v3731_v10 = vadd.f32 %v1216_v8, %v3519_v0  ;;  %v1219_v13 = vadd.f32 %v2687_v24, %v1218_v9  ;;  %v2938_v14 = vpop.f32.mrb[39].mxu1  ;;  %v3137_v0 = vld [vmem:[%s4036_s12 + $0x8] sm:$0xff]  }
 0xd6d   :  { %2949 = vmatprep.subr.bf16.mxu1 %v3137_v0 }
 0xd6e   :  { %v3734_v16 = vadd.f32 %v1219_v13, %v3524_v1  ;;  %v1226_v17 = vsel %vm133_vm0, %v3731_v10, 0.0  ;;  %v113_v1 = vld [vmem:[%s4053_s5] sm:$0xff]  ;;  %2950 = vmatpush3.bf16.msra.mxu1 %v3137_v0 }
 0xd6f   :  { %1227 = vadd.xlane.f32.xlu1 %v1226_v17  ;;  %v121_v23 = vcombine.high %v113_v1, %v113_v1  ;;  %2961 = vmatprep.subr.bf16.mxu1 %v3349_v15 }
 0xd70   :  { %v1229_v18 = vsel %vm133_vm0, %v3734_v16, 0.0 }
 0xd71   :  { %1230 = vadd.xlane.f32.xlu0 %v1229_v18  ;;  %v123_v28 = vcombine.low %v113_v1, %v121_v23 }
 0xd73   :  { %v129_v29 = vpack.c.bf16 %v124_v27, %v123_v28 }
 0xd75   :  { %2951 = vmatprep.mubr.msk.bf16.mxu1 %vm133_vm0, %v129_v29 }
 0xd76   :  { %2952 = vmatmul.mubr.msk.bf16.vlgmr.msra.gmra.mrb[40].mxu1 %vm133_vm0, %v130_v7 }
 0xd77   :  { %2963 = vmatprep.mubr.msk.bf16.mxu1 %vm3350_vm1, %v3349_v15 }
 0xdfc   :  { %v1228_v11 = vpop.xlane.xlu1 %1227 }
 0xdfd   :  { %v1232_v12 = vmul.f32 0.03125, %v1228_v11 }
 0xdfe   :  { %v1231_v30 = vpop.xlane.xlu0 %1230 }
 0xdff   :  { %v1234_v31 = vsub.f32 %v3731_v10, %v1232_v12  ;;  %v1233_v32 = vmul.f32 0.03125, %v1231_v30 }
 0xe01   :  { %v1235_v33 = vsub.f32 %v3734_v16, %v1233_v32  ;;  %v1236_v34 = vmul.f32 %v1234_v31, %v1234_v31 }
 0xe03   :  { %v1238_v36 = vsel %vm133_vm0, %v1236_v34, 0.0  ;;  %v1237_v37 = vmul.f32 %v1235_v33, %v1235_v33 }
 0xe04   :  { %1239 = vadd.xlane.f32.xlu0 %v1238_v36 }
 0xe05   :  { %v1241_v39 = vsel %vm133_vm0, %v1237_v37, 0.0 }
 0xe08   :  { %1242 = vadd.xlane.f32.xlu0 %v1241_v39 }
 0xe49   :  { %v2953_v46 = vpop.f32.mrb[40].mxu1 }
 0xe4a   :  { %v1411_v47 = vpack.c.bf16 %v2953_v46, %v2953_v46  ;;  %v1385_v49 = vpop.f32.mrb[41].mxu1 }
 0xe4b   :  { %v2954_v50 = vpop.f32.mrb[42].mxu1 }
 0xe4c   :  { %v1437_v51 = vrot.slane %v1411_v47, %v1420_v48  ;;  %v1388_v52 = vpop.f32.mrb[43].mxu1 }
 0xe4d   :  { %v1410_v53 = vpack.c.bf16 %v1388_v52, %v1385_v49  ;;  %v2702_v54 = vpack.c.bf16 %v1388_v52, %v1388_v52 }
 0xe4e   :  { %v1438_v55 = vcombine.high %v1437_v51, %v1437_v51 }
 0xe4f   :  { %v1421_v56 = vrot.slane %v1410_v53, %v1420_v48  ;;  %v1428_v57 = vrot.slane %v2702_v54, %v1420_v48 }
 0xe50   :  { %v1515_v60 = vrot.slane %v1438_v55, %v1420_v48 }
 0xe51   :  { %v1429_v58 = vcombine.high %v1421_v56, %v1421_v56  ;;  %v1430_v59 = vcombine.high %v1428_v57, %v1428_v57  ;;  %v1453_v62 = vrot.slane %v1428_v57, %v1420_v48 }
 0xe53   :  { %v1439_v61 = vcombine.low %v1421_v56, %v1429_v58  ;;  %v1501_v63 = vcombine.low %v1430_v59, %v1437_v51 }
 0xe55   :  { %v1446_v2 = vrot.slane %v1439_v61, %v1420_v48  ;;  %v1508_v3 = vrot.slane %v1501_v63, %v1420_v48 }
 0xe57   :  { %v3775_v4 = vcombine.low %v1446_v2, %v1453_v62  ;;  %v3777_v5 = vcombine.low %v1508_v3, %v1515_v60 }
 0xe59   :  { %v1521_v24 = vsel %vm251_vm2, %v3777_v5, 0  ;;  %v1459_v28 = vsel %vm251_vm2, %v3775_v4, 0 }
 0xe5a   :  { %2962 = vmatpush3.bf16.xpose.msra.mxu1 %v1521_v24 }
 0xe5b   :  { %2973 = vmatprep.subr.bf16.mxu1 %v3349_v15 }
 0xe91   :  { %v1240_v6 = vpop.xlane.xlu0 %1239 }
 0xe92   :  { %v1244_v8 = vmul.f32 0.03125, %v1240_v6 }
 0xe94   :  { %v1246_v21 = vadd.f32 1e-05, %v1244_v8 }
 0xe95   :  { %v1243_v9 = vpop.xlane.xlu0 %1242 }
 0xe96   :  { %3187 = vrsqrt.f32 %v1246_v21  ;;  %v1245_v13 = vmul.f32 0.03125, %v1243_v9 }
 0xe98   :  { %v1247_v14 = vadd.f32 1e-05, %v1245_v13 }
 0xe9a   :  { %3189 = vrsqrt.f32 %v1247_v14 }
 0xea0   :  { %v3188_v17 = vpop.eup %3187 }
 0xea1   :  { %v1250_v18 = vmul.f32 %v3188_v17, %v1234_v31 }
 0xea3   :  { %v1258_v1 = vmul.f32 %v2691_v19, %v1250_v18 }
 0xea4   :  { %v3190_v0 = vpop.eup %3189 }
 0xea5   :  { %v1251_v20 = vmul.f32 %v3190_v0, %v1235_v33  ;;  %v1266_v25 = vadd.f32 %v2692_v22, %v1258_v1 }
 0xea7   :  { %v1259_v23 = vmul.f32 %v2691_v19, %v1251_v20 }
 0xea9   :  { %v1267_v26 = vadd.f32 %v2692_v22, %v1259_v23 }
 0xeab   :  { %v1268_v27 = vpack.c.bf16 %v1267_v26, %v1266_v25 }
 0xead   :  { %2944 = vmatmul.mubr.msk.bf16.vlgmr.msra.gmra.mrb[32].mxu0 %vm133_vm0, %v1268_v27 }
 0xeae   :  { %2956 = vmatpush3.bf16.xpose.msra.mxu0 %v1459_v28  ;;  %2957 = vmatprep.mubr.msk.bf16.mxu0 %vm3350_vm1, %v3349_v15 }
 0xeaf   :  { %2967 = vmatprep.subr.bf16.mxu0 %v3349_v15 }
 0xf80   :  { %v1322_v38 = vpop.f32.mrb[32].mxu0 }
 0xf81   :  { %v3788_v29 = vpack.c.bf16 %v1322_v38, %v1322_v38  ;;  %v2945_v7 = vpop.f32.mrb[33].mxu0 }
 0xf82   :  { %v1325_v11 = vpop.f32.mrb[34].mxu0 }
 0xf83   :  { %v3790_v12 = vpack.c.bf16 %v1325_v11, %v1325_v11  ;;  %v2946_v30 = vpop.f32.mrb[35].mxu0  ;;  %2958 = vmatmul.mubr.msk.bf16.vlgmr.msra.gmra.mrb[36].mxu0 %vm251_vm2, %v3788_v29 }
 0xf84   :  { %2969 = vmatprep.mubr.msk.bf16.mxu0 %vm3350_vm1, %v3349_v15 }
 0xf85   :  { %2964 = vmatmul.mubr.msk.bf16.vlgmr.msra.gmra.mrb[44].mxu1 %vm251_vm2, %v3790_v12 }
 0xf86   :  { %2975 = vmatprep.mubr.msk.bf16.mxu1 %vm3350_vm1, %v3349_v15 }
0x1056   :  { %v1495_v31 = vpop.f32.mrb[36].mxu0 }
0x1057   :  { %v2959_v32 = vpop.f32.mrb[37].mxu0  ;;  %v1564_v33 = vsel %vm1563_vm6, %v1495_v31, -inf }
0x1058   :  { %v1557_v34 = vpop.f32.mrb[44].mxu1  ;;  %1565 = vmax.xlane.f32.xlu1 %v1564_v33  ;;  %v1498_v36 = vpop.f32.mrb[38].mxu0 }
0x1059   :  { %v2960_v37 = vpop.f32.mrb[39].mxu0  ;;  %v2965_v39 = vpop.f32.mrb[45].mxu1  ;;  %v1567_v40 = vsel %vm1563_vm6, %v1557_v34, -inf }
0x105a   :  { %1568 = vmax.xlane.f32.xlu0 %v1567_v40  ;;  %v1560_v35 = vpop.f32.mrb[46].mxu1 }
0x105b   :  { %v2966_v41 = vpop.f32.mrb[47].mxu1 }
0x1069   :  { %1588 = vrot.lane.b32.xlu1 %v3775_v4, %s3351_s1 }
0x10e5   :  { %v1566_v42 = vpop.xlane.xlu1 %1565 }
0x10e6   :  { %v1570_v43 = vsub.f32 %v1495_v31, %v1566_v42 }
0x10e7   :  { %v1569_v44 = vpop.xlane.xlu0 %1568 }
0x10e8   :  { %v1572_v45 = vmul.f32 1.442695, %v1570_v43  ;;  %v1571_v46 = vsub.f32 %v1557_v34, %v1569_v44 }
0x10e9   :  { %v1589_v47 = vpop.permute.xlu1 %1588 }
0x10ea   :  { %3191 = vpow2.f32 %v1572_v45  ;;  %v1574_v48 = vmul.f32 1.442695, %v1571_v46  ;;  %v1595_v49 = vsel %vm1593_vm7, %v1589_v47, 0 }
0x10eb   :  { %2968 = vmatpush3.bf16.msra.mxu0 %v1595_v49 }
0x10ec   :  { %3193 = vpow2.f32 %v1574_v48  ;;  %2979 = vmatprep.subr.bf16.mxu0 %v3349_v15 }
0x10f4   :  { %v3192_v50 = vpop.eup %3191 }
0x10f5   :  { %v1576_v51 = vsel %vm1563_vm6, %v3192_v50, 0.0 }
0x10f6   :  { %v3194_v52 = vpop.eup %3193  ;;  %1577 = vadd.xlane.f32.xlu1 %v1576_v51 }
0x10f7   :  { %v1579_v53 = vsel %vm1563_vm6, %v3194_v52, 0.0 }
0x10f8   :  { %1580 = vadd.xlane.f32.xlu0 %v1579_v53 }
0x1107   :  { %1687 = vrot.lane.b32.xlu1 %v3775_v4, %s3354_s6 }
0x110b   :  { %1737 = vrot.lane.b32.xlu1 %v3777_v5, %s3354_s6 }
0x110e   :  { %1637 = vrot.lane.b32.xlu0 %v3777_v5, %s3351_s1 }
0x110f   :  { %1685 = vrot.lane.b32.xlu1 %v3788_v29, %s3354_s6 }
0x1112   :  { %1735 = vrot.lane.b32.xlu0 %v3790_v12, %s3354_s6 }
0x1183   :  { %v1578_v54 = vpop.xlane.xlu1 %1577 }
0x1184   :  { %3195 = vrcp.f32 %v1578_v54 }
0x1185   :  { %v1581_v55 = vpop.xlane.xlu0 %1580 }
0x1186   :  { %3197 = vrcp.f32 %v1581_v55 }
0x1187   :  { %v1688_v58 = vpop.permute.xlu1 %1687 }
0x1188   :  { %v1693_v3 = vsel %vm251_vm2, %v1688_v58, 0 }
0x1189   :  { %v1638_v56 = vpop.permute.xlu0 %1637 }
0x118a   :  { %v1643_v57 = vsel %vm1593_vm7, %v1638_v56, 0 }
0x118b   :  { %2974 = vmatpush3.bf16.msra.mxu1 %v1643_v57  ;;  %v1738_v2 = vpop.permute.xlu1 %1737 }
0x118c   :  { %2985 = vmatprep.subr.bf16.mxu1 %v3349_v15  ;;  %v1743_v6 = vsel %vm251_vm2, %v1738_v2, 0 }
0x118d   :  { %v1736_v21 = vpop.permute.xlu0 %1735 }
0x118e   :  { %v3196_v59 = vpop.eup %3195 }
0x118f   :  { %v1584_v60 = vmul.f32 %v3196_v59, %v3192_v50  ;;  %v1686_v8 = vpop.permute.xlu1 %1685 }
0x1190   :  { %v3198_v61 = vpop.eup %3197 }
0x1191   :  { %v1585_v62 = vmul.f32 %v3198_v61, %v3194_v52  ;;  %v1586_v63 = vpack.c.bf16 %v1584_v60, %v1584_v60 }
0x1193   :  { %2970 = vmatmul.mubr.msk.bf16.vlgmr.msra.gmra.mrb[40].mxu0 %vm1563_vm6, %v1586_v63  ;;  %v1587_v24 = vpack.c.bf16 %v1585_v62, %v1585_v62 }
0x1194   :  { %2980 = vmatpush3.bf16.xpose.msra.mxu0 %v1693_v3  ;;  %2981 = vmatprep.mubr.msk.bf16.mxu0 %vm3350_vm1, %v3349_v15 }
0x1195   :  { %2976 = vmatmul.mubr.msk.bf16.vlgmr.msra.gmra.mrb[48].mxu1 %vm1563_vm6, %v1587_v24  ;;  %2991 = vmatprep.subr.bf16.mxu0 %v3349_v15 }
0x1196   :  { %2986 = vmatpush3.bf16.xpose.msra.mxu1 %v1743_v6  ;;  %2987 = vmatprep.mubr.msk.bf16.mxu1 %vm3350_vm1, %v3349_v15 }
0x1197   :  { %2997 = vmatprep.subr.bf16.mxu1 %v3349_v15 }
0x119b   :  { %2982 = vmatmul.mubr.msk.bf16.vlgmr.msra.gmra.mrb[44].mxu0 %vm251_vm2, %v1686_v8 }
0x119c   :  { %2993 = vmatprep.mubr.msk.bf16.mxu0 %vm3350_vm1, %v3349_v15 }
0x119d   :  { %2988 = vmatmul.mubr.msk.bf16.vlgmr.msra.gmra.mrb[52].mxu1 %vm251_vm2, %v1736_v21 }
0x119e   :  { %2999 = vmatprep.mubr.msk.bf16.mxu1 %vm3350_vm1, %v3349_v15 }
0x1266   :  { %v3836_v9 = vpop.f32.mrb[40].mxu0 }
0x1267   :  { %v2971_v13 = vpop.f32.mrb[41].mxu0 }
0x1268   :  { %v1634_v14 = vpop.f32.mrb[42].mxu0  ;;  %v3838_v17 = vpop.f32.mrb[48].mxu1 }
0x1269   :  { %v2972_v18 = vpop.f32.mrb[43].mxu0  ;;  %v2977_v19 = vpop.f32.mrb[49].mxu1 }
0x126a   :  { %v1682_v0 = vpop.f32.mrb[50].mxu1 }
0x126b   :  { %v2978_v1 = vpop.f32.mrb[51].mxu1 }
0x126e   :  { %v1729_v20 = vpop.f32.mrb[44].mxu0 }
0x126f   :  { %v2983_v22 = vpop.f32.mrb[45].mxu0  ;;  %v1785_v23 = vsel %vm1563_vm6, %v1729_v20, -inf }
0x1270   :  { %v1779_v25 = vpop.f32.mrb[52].mxu1  ;;  %1786 = vmax.xlane.f32.xlu1 %v1785_v23  ;;  %v1732_v26 = vpop.f32.mrb[46].mxu0 }
0x1271   :  { %v2984_v27 = vpop.f32.mrb[47].mxu0  ;;  %v2989_v28 = vpop.f32.mrb[53].mxu1  ;;  %v1788_v38 = vsel %vm1563_vm6, %v1779_v25, -inf }
0x1272   :  { %1789 = vmax.xlane.f32.xlu0 %v1788_v38  ;;  %v1782_v7 = vpop.f32.mrb[54].mxu1 }
0x1273   :  { %v2990_v11 = vpop.f32.mrb[55].mxu1 }
0x1281   :  { %1809 = vrot.lane.b32.xlu1 %v3775_v4, %s3353_s2 }
0x1285   :  { %1907 = vrot.lane.b32.xlu1 %v3775_v4, %s3357_s24 }
0x1289   :  { %1957 = vrot.lane.b32.xlu1 %v3777_v5, %s3357_s24 }
0x128d   :  { %1905 = vrot.lane.b32.xlu1 %v3788_v29, %s3357_s24 }
0x12fd   :  { %v1787_v30 = vpop.xlane.xlu1 %1786 }
0x12fe   :  { %v1791_v31 = vsub.f32 %v1729_v20, %v1787_v30 }
0x12ff   :  { %v1790_v32 = vpop.xlane.xlu0 %1789 }
0x1300   :  { %v1793_v33 = vmul.f32 1.442695, %v1791_v31  ;;  %v1792_v34 = vsub.f32 %v1779_v25, %v1790_v32 }
0x1301   :  { %v1810_v36 = vpop.permute.xlu1 %1809 }
0x1302   :  { %3199 = vpow2.f32 %v1793_v33  ;;  %v1795_v37 = vmul.f32 1.442695, %v1792_v34  ;;  %v1815_v39 = vsel %vm1593_vm7, %v1810_v36, 0 }
0x1303   :  { %2992 = vmatpush3.bf16.msra.mxu0 %v1815_v39 }
0x1304   :  { %3201 = vpow2.f32 %v1795_v37  ;;  %3003 = vmatprep.subr.bf16.mxu0 %v3349_v15 }
0x1305   :  { %v1908_v48 = vpop.permute.xlu1 %1907 }
0x1306   :  { %v1913_v52 = vsel %vm251_vm2, %v1908_v48, 0 }
0x1309   :  { %v1958_v54 = vpop.permute.xlu1 %1957 }
0x130a   :  { %v1963_v56 = vsel %vm251_vm2, %v1958_v54, 0 }
0x130c   :  { %v3200_v40 = vpop.eup %3199 }
0x130d   :  { %v1797_v35 = vsel %vm1563_vm6, %v3200_v40, 0.0  ;;  %v1906_v57 = vpop.permute.xlu1 %1905 }
0x130e   :  { %v3202_v41 = vpop.eup %3201  ;;  %1798 = vadd.xlane.f32.xlu0 %v1797_v35 }
0x130f   :  { %v1800_v42 = vsel %vm1563_vm6, %v3202_v41, 0.0 }
0x1312   :  { %1801 = vadd.xlane.f32.xlu0 %v1800_v42 }
0x1328   :  { %1857 = vrot.lane.b32.xlu0 %v3777_v5, %s3353_s2 }
0x132c   :  { %1955 = vrot.lane.b32.xlu0 %v3790_v12, %s3357_s24 }
0x139b   :  { %v1799_v43 = vpop.xlane.xlu0 %1798 }
0x139c   :  { %3203 = vrcp.f32 %v1799_v43 }
0x139f   :  { %v1802_v44 = vpop.xlane.xlu0 %1801 }
0x13a0   :  { %3205 = vrcp.f32 %v1802_v44 }
0x13a3   :  { %v1858_v45 = vpop.permute.xlu0 %1857 }
0x13a4   :  { %v1863_v46 = vsel %vm1593_vm7, %v1858_v45, 0 }
0x13a5   :  { %2998 = vmatpush3.bf16.msra.mxu1 %v1863_v46 }
0x13a6   :  { %v3204_v47 = vpop.eup %3203  ;;  %3009 = vmatprep.subr.bf16.mxu1 %v3349_v15 }
0x13a7   :  { %v1805_v49 = vmul.f32 %v3204_v47, %v3200_v40  ;;  %v1956_v58 = vpop.permute.xlu0 %1955 }
0x13a9   :  { %v1807_v50 = vpack.c.bf16 %v1805_v49, %v1805_v49 }
0x13aa   :  { %v3206_v51 = vpop.eup %3205 }
0x13ab   :  { %v1806_v53 = vmul.f32 %v3206_v51, %v3202_v41  ;;  %2994 = vmatmul.mubr.msk.bf16.vlgmr.msra.gmra.mrb[48].mxu0 %vm1563_vm6, %v1807_v50 }
0x13ac   :  { %3004 = vmatpush3.bf16.xpose.msra.mxu0 %v1913_v52  ;;  %3005 = vmatprep.mubr.msk.bf16.mxu0 %vm3350_vm1, %v3349_v15 }
0x13ad   :  { %v1808_v55 = vpack.c.bf16 %v1806_v53, %v1806_v53  ;;  %3015 = vmatprep.subr.bf16.mxu0 %v3349_v15 }
0x13af   :  { %3000 = vmatmul.mubr.msk.bf16.vlgmr.msra.gmra.mrb[56].mxu1 %vm1563_vm6, %v1808_v55 }
0x13b0   :  { %3010 = vmatpush3.bf16.xpose.msra.mxu1 %v1963_v56  ;;  %3011 = vmatprep.mubr.msk.bf16.mxu1 %vm3350_vm1, %v3349_v15 }
0x13b1   :  { %3021 = vmatprep.subr.bf16.mxu1 %v3349_v15 }
0x13b3   :  { %3006 = vmatmul.mubr.msk.bf16.vlgmr.msra.gmra.mrb[52].mxu0 %vm251_vm2, %v1906_v57 }
0x13b4   :  { %3017 = vmatprep.mubr.msk.bf16.mxu0 %vm3350_vm1, %v3349_v15 }
0x13b7   :  { %3012 = vmatmul.mubr.msk.bf16.vlgmr.msra.gmra.mrb[60].mxu1 %vm251_vm2, %v1956_v58 }
0x13b8   :  { %3023 = vmatprep.mubr.msk.bf16.mxu1 %vm3350_vm1, %v3349_v15 }
0x147e   :  { %v3876_v59 = vpop.f32.mrb[48].mxu0 }
0x147f   :  { %v2995_v60 = vpop.f32.mrb[49].mxu0 }
0x1480   :  { %v1854_v61 = vpop.f32.mrb[50].mxu0 }
0x1481   :  { %v2996_v62 = vpop.f32.mrb[51].mxu0 }
0x1482   :  { %v3878_v63 = vpop.f32.mrb[56].mxu1 }
0x1483   :  { %v3117_v2 = vpack.i.bf16 %v3878_v63, %v3876_v59  ;;  %v3001_v3 = vpop.f32.mrb[57].mxu1 }
0x1484   :  { %v1902_v24 = vpop.f32.mrb[58].mxu1 }
0x1485   :  { %v3002_v6 = vpop.f32.mrb[59].mxu1 }
0x1486   :  { %v1949_v8 = vpop.f32.mrb[52].mxu0 }
0x1487   :  { %v3007_v21 = vpop.f32.mrb[53].mxu0  ;;  %v2005_v13 = vsel %vm1563_vm6, %v1949_v8, -inf }
0x1488   :  { %2006 = vmax.xlane.f32.xlu1 %v2005_v13  ;;  %v1952_v14 = vpop.f32.mrb[54].mxu0 }
0x1489   :  { %v3008_v18 = vpop.f32.mrb[55].mxu0 }
0x148a   :  { %v1999_v19 = vpop.f32.mrb[60].mxu1 }
0x148b   :  { %v3013_v0 = vpop.f32.mrb[61].mxu1  ;;  %v2008_v1 = vsel %vm1563_vm6, %v1999_v19, -inf }
0x148c   :  { %2009 = vmax.xlane.f32.xlu0 %v2008_v1  ;;  %v2002_v20 = vpop.f32.mrb[62].mxu1 }
0x148d   :  { %v3014_v22 = vpop.f32.mrb[63].mxu1 }
0x1499   :  { %2029 = vrot.lane.b32.xlu1 %v3775_v4, %s3356_s23 }
0x149d   :  { %2127 = vrot.lane.b32.xlu1 %v3775_v4, %s3360_s25 }
0x14a1   :  { %2177 = vrot.lane.b32.xlu1 %v3777_v5, %s3360_s25 }
0x14a5   :  { %2125 = vrot.lane.b32.xlu1 %v3788_v29, %s3360_s25 }
0x1515   :  { %v2007_v23 = vpop.xlane.xlu1 %2006 }
0x1516   :  { %v2011_v25 = vsub.f32 %v1949_v8, %v2007_v23 }
0x1518   :  { %v2013_v26 = vmul.f32 1.442695, %v2011_v25 }
0x1519   :  { %v2010_v27 = vpop.xlane.xlu0 %2009  ;;  %v2030_v28 = vpop.permute.xlu1 %2029 }
0x151a   :  { %3207 = vpow2.f32 %v2013_v26  ;;  %v2012_v38 = vsub.f32 %v1999_v19, %v2010_v27  ;;  %v2035_v7 = vsel %vm1593_vm7, %v2030_v28, 0 }
0x151b   :  { %3016 = vmatpush3.bf16.msra.mxu0 %v2035_v7 }
0x151c   :  { %v2015_v11 = vmul.f32 1.442695, %v2012_v38  ;;  %3027 = vmatprep.subr.bf16.mxu0 %v3349_v15 }
0x151d   :  { %v2128_v40 = vpop.permute.xlu1 %2127 }
0x151e   :  { %3209 = vpow2.f32 %v2015_v11  ;;  %v2133_v43 = vsel %vm251_vm2, %v2128_v40, 0 }
0x1524   :  { %v3208_v30 = vpop.eup %3207 }
0x1525   :  { %v2017_v31 = vsel %vm1563_vm6, %v3208_v30, 0.0 }
0x1526   :  { %2018 = vadd.xlane.f32.xlu0 %v2017_v31 }
0x1528   :  { %v3210_v32 = vpop.eup %3209 }
0x1529   :  { %v2020_v29 = vsel %vm1563_vm6, %v3210_v32, 0.0 }
0x152a   :  { %2021 = vadd.xlane.f32.xlu0 %v2020_v29  ;;  %v3144_v29 = vld [vmem:[%s4037_s13 + $0x8] sm:$0xff]  }
0x1540   :  { %2077 = vrot.lane.b32.xlu0 %v3777_v5, %s3356_s23 }
0x1544   :  { %2175 = vrot.lane.b32.xlu0 %v3790_v12, %s3360_s25  ;;  %v2178_v12 = vpop.permute.xlu1 %2177 }
0x1545   :  { %v2183_v46 = vsel %vm251_vm2, %v2178_v12, 0 }
0x1548   :  { %v2126_v47 = vpop.permute.xlu1 %2125 }
0x15b3   :  { %v2019_v33 = vpop.xlane.xlu0 %2018 }
0x15b4   :  { %3211 = vrcp.f32 %v2019_v33 }
0x15b7   :  { %v2022_v34 = vpop.xlane.xlu0 %2021 }
0x15b8   :  { %3213 = vrcp.f32 %v2022_v34 }
0x15bb   :  { %v2078_v36 = vpop.permute.xlu0 %2077 }
0x15bc   :  { %v2083_v37 = vsel %vm1593_vm7, %v2078_v36, 0 }
0x15bd   :  { %3022 = vmatpush3.bf16.msra.mxu1 %v2083_v37 }
0x15be   :  { %v3212_v39 = vpop.eup %3211  ;;  %3033 = vmatprep.subr.bf16.mxu1 %v3349_v15 }
0x15bf   :  { %v2025_v35 = vmul.f32 %v3212_v39, %v3208_v30  ;;  %v2176_v48 = vpop.permute.xlu0 %2175 }
0x15c1   :  { %v2027_v41 = vpack.c.bf16 %v2025_v35, %v2025_v35 }
0x15c2   :  { %v3214_v42 = vpop.eup %3213 }
0x15c3   :  { %v2026_v44 = vmul.f32 %v3214_v42, %v3210_v32  ;;  %3018 = vmatmul.mubr.msk.bf16.vlgmr.msra.gmra.mrb[56].mxu0 %vm1563_vm6, %v2027_v41  ;;  %v3143_v32 = vld [vmem:[%s4037_s13] sm:$0xff]  }
0x15c4   :  { %3028 = vmatpush3.bf16.xpose.msra.mxu0 %v2133_v43  ;;  %3029 = vmatprep.mubr.msk.bf16.mxu0 %vm3350_vm1, %v3349_v15 }
0x15c5   :  { %v2028_v45 = vpack.c.bf16 %v2026_v44, %v2026_v44  ;;  %3039 = vmatprep.subr.bf16.mxu0 %v3349_v15 }
0x15c7   :  { %3024 = vmatmul.mubr.msk.bf16.vlgmr.msra.gmra.mrb[64].mxu1 %vm1563_vm6, %v2028_v45 }
0x15c8   :  { %3034 = vmatpush3.bf16.xpose.msra.mxu1 %v2183_v46  ;;  %3035 = vmatprep.mubr.msk.bf16.mxu1 %vm3350_vm1, %v3349_v15 }
0x15c9   :  { %3045 = vmatprep.subr.bf16.mxu1 %v3349_v15 }
0x15cb   :  { %3030 = vmatmul.mubr.msk.bf16.vlgmr.msra.gmra.mrb[60].mxu0 %vm251_vm2, %v2126_v47 }
0x15cc   :  { %3041 = vmatprep.mubr.msk.bf16.mxu0 %vm3350_vm1, %v3349_v15 }
0x15cf   :  { %3036 = vmatmul.mubr.msk.bf16.vlgmr.msra.gmra.mrb[68].mxu1 %vm251_vm2, %v2176_v48 }
0x15d0   :  { %3047 = vmatprep.mubr.msk.bf16.mxu1 %vm3350_vm1, %v3349_v15 }
0x1696   :  { %v2071_v49 = vpop.f32.mrb[56].mxu0 }
0x1697   :  { %v3019_v50 = vpop.f32.mrb[57].mxu0 }
0x1698   :  { %v2074_v51 = vpop.f32.mrb[58].mxu0 }
0x1699   :  { %v3020_v52 = vpop.f32.mrb[59].mxu0 }
0x169a   :  { %v2119_v53 = vpop.f32.mrb[64].mxu1 }
0x169b   :  { %v3122_v54 = vpack.i.bf16 %v2119_v53, %v2071_v49  ;;  %v3025_v55 = vpop.f32.mrb[65].mxu1 }
0x169c   :  { %v2122_v56 = vpop.f32.mrb[66].mxu1 }
0x169d   :  { %v3026_v57 = vpop.f32.mrb[67].mxu1 }
0x169e   :  { %v2169_v58 = vpop.f32.mrb[60].mxu0 }
0x169f   :  { %v3031_v60 = vpop.f32.mrb[61].mxu0  ;;  %v2225_v61 = vsel %vm1563_vm6, %v2169_v58, -inf }
0x16a0   :  { %2226 = vmax.xlane.f32.xlu1 %v2225_v61  ;;  %v2172_v62 = vpop.f32.mrb[62].mxu0 }
0x16a1   :  { %v3032_v3 = vpop.f32.mrb[63].mxu0 }
0x16a2   :  { %v2219_v24 = vpop.f32.mrb[68].mxu1 }
0x16a3   :  { %v3037_v6 = vpop.f32.mrb[69].mxu1  ;;  %v2228_v8 = vsel %vm1563_vm6, %v2219_v24, -inf }
0x16a4   :  { %2229 = vmax.xlane.f32.xlu0 %v2228_v8  ;;  %v2222_v21 = vpop.f32.mrb[70].mxu1 }
0x16a5   :  { %v3038_v13 = vpop.f32.mrb[71].mxu1 }
0x16b1   :  { %2249 = vrot.lane.b32.xlu1 %v3775_v4, %s3359_s21 }
0x16b5   :  { %3118 = vrot.lane.b32.xlu1 %v3117_v2, %s3362_s29 }
0x16b9   :  { %3123 = vrot.lane.b32.xlu1 %v3122_v54, %s3363_s3 }
0x172d   :  { %v2227_v14 = vpop.xlane.xlu1 %2226 }
0x172e   :  { %v2231_v18 = vsub.f32 %v2169_v58, %v2227_v14 }
0x1730   :  { %v2233_v19 = vmul.f32 1.442695, %v2231_v18 }
0x1731   :  { %v2230_v0 = vpop.xlane.xlu0 %2229  ;;  %v2250_v1 = vpop.permute.xlu1 %2249 }
0x1732   :  { %3215 = vpow2.f32 %v2233_v19  ;;  %v2232_v20 = vsub.f32 %v2219_v24, %v2230_v0  ;;  %v2255_v22 = vsel %vm1593_vm7, %v2250_v1, 0 }
0x1733   :  { %3040 = vmatpush3.bf16.msra.mxu0 %v2255_v22 }
0x1734   :  { %v2235_v23 = vmul.f32 1.442695, %v2232_v20  ;;  %3051 = vmatprep.subr.bf16.mxu0 %v3349_v15 }
0x1735   :  { %v3119_v43 = vpop.permute.xlu1 %3118 }
0x1736   :  { %3217 = vpow2.f32 %v2235_v23  ;;  %v3121_v12 = vunpack.i.h.bf16 %v3119_v43  ;;  %v3120_v45 = vunpack.i.l.bf16 %v3119_v43  ;;  %v3145_v23 = vld [vmem:[%s4039_s15] sm:$0xff]  }
0x1738   :  { %v2370_v49 = vsel %vm251_vm2, %v3838_v17, %v3121_v12  ;;  %v2369_v50 = vsel %vm251_vm2, %v3836_v9, %v3120_v45  ;;  %v2719_v9 = vld [vmem:[%s4038_s14] ss:$0 sm:$0xff] }
0x1739   :  { %v3124_v44 = vpop.permute.xlu1 %3123 }
0x173a   :  { %v3126_v46 = vunpack.i.h.bf16 %v3124_v44  ;;  %v3125_v47 = vunpack.i.l.bf16 %v3124_v44 }
0x173c   :  { %v3216_v4 = vpop.eup %3215  ;;  %v2371_v53 = vsel %vm1153_vm4, %v2369_v50, %v3125_v47  ;;  %v2372_v54 = vsel %vm1153_vm4, %v2370_v49, %v3126_v46  ;;  %v2734_v49 = vld [vmem:[%s4042_s18] ss:$0 sm:$0xff] }
0x173d   :  { %v2237_v59 = vsel %vm1563_vm6, %v3216_v4, 0.0 }
0x173e   :  { %2238 = vadd.xlane.f32.xlu0 %v2237_v59  ;;  %v3147_v59 = vld [vmem:[%s4041_s17] sm:$0xff]  }
0x1740   :  { %v3218_v63 = vpop.eup %3217 }
0x1741   :  { %v2240_v2 = vsel %vm1563_vm6, %v3218_v63, 0.0 }
0x1742   :  { %2241 = vadd.xlane.f32.xlu0 %v2240_v2 }
0x1758   :  { %2297 = vrot.lane.b32.xlu0 %v3777_v5, %s3359_s21 }
0x17cb   :  { %v2239_v25 = vpop.xlane.xlu0 %2238 }
0x17cc   :  { %3219 = vrcp.f32 %v2239_v25 }
0x17cf   :  { %v2242_v26 = vpop.xlane.xlu0 %2241 }
0x17d0   :  { %3221 = vrcp.f32 %v2242_v26 }
0x17d3   :  { %v2298_v27 = vpop.permute.xlu0 %2297 }
0x17d4   :  { %v2303_v28 = vsel %vm1593_vm7, %v2298_v27, 0 }
0x17d5   :  { %3046 = vmatpush3.bf16.msra.mxu1 %v2303_v28 }
0x17d6   :  { %v3220_v38 = vpop.eup %3219  ;;  %3059 = vmatprep.subr.bf16.mxu1 %v3349_v15 }
0x17d7   :  { %v2245_v7 = vmul.f32 %v3220_v38, %v3216_v4  ;;  %v3146_v4 = vld [vmem:[%s4039_s15 + $0x8] sm:$0xff]  }
0x17d9   :  { %v2247_v11 = vpack.c.bf16 %v2245_v7, %v2245_v7 }
0x17da   :  { %v3222_v30 = vpop.eup %3221 }
0x17db   :  { %v2246_v31 = vmul.f32 %v3222_v30, %v3218_v63  ;;  %3042 = vmatmul.mubr.msk.bf16.vlgmr.msra.gmra.mrb[64].mxu0 %vm1563_vm6, %v2247_v11  ;;  %v3148_v63 = vld [vmem:[%s4041_s17 + $0x8] sm:$0xff]   ;;  %v2723_v30 = vld [vmem:[#allocation7] ss:$0 sm:$0xff] }
0x17dc   :  { %3055 = vmatprep.mubr.msk.bf16.mxu0 %vm3350_vm1, %v3349_v15  ;;  %3052 = vmatpush3.bf16.msra.mxu0 %v3143_v32 }
0x17dd   :  { %v2248_v5 = vpack.c.bf16 %v2246_v31, %v2246_v31  ;;  %3053 = vmatprep.subr.bf16.mxu0 %v3349_v15 }
0x17df   :  { %3048 = vmatmul.mubr.msk.bf16.vlgmr.msra.gmra.mrb[72].mxu1 %vm1563_vm6, %v2248_v5 }
0x17e0   :  { %3063 = vmatprep.mubr.msk.bf16.mxu1 %vm3350_vm1, %v3349_v15  ;;  %3054 = vmatpush3.bf16.msra.mxu0 %v3144_v29  ;;  %v2724_v29 = vld [vmem:[#allocation8] ss:$0 sm:$0xff] }
0x17e1   :  { %3067 = vmatprep.subr.bf16.mxu0 %v3349_v15  ;;  %3060 = vmatpush3.bf16.msra.mxu1 %v3145_v23 }
0x17e2   :  { %3061 = vmatprep.subr.bf16.mxu1 %v3349_v15 }
0x17e5   :  { %3062 = vmatpush3.bf16.msra.mxu1 %v3146_v4 }
0x18ae   :  { %v2291_v33 = vpop.f32.mrb[64].mxu0 }
0x18af   :  { %v3043_v34 = vpop.f32.mrb[65].mxu0 }
0x18b0   :  { %v2294_v36 = vpop.f32.mrb[66].mxu0 }
0x18b1   :  { %v3044_v37 = vpop.f32.mrb[67].mxu0 }
0x18b2   :  { %v2339_v39 = vpop.f32.mrb[72].mxu1 }
0x18b3   :  { %v3127_v40 = vpack.i.bf16 %v2339_v39, %v2291_v33  ;;  %v3049_v35 = vpop.f32.mrb[73].mxu1  ;;  %v3149_v39 = vld [vmem:[%s4041_s17 + $0x10] sm:$0xff]  }
0x18b4   :  { %v2342_v41 = vpop.f32.mrb[74].mxu1  ;;  %v2725_v35 = vld [vmem:[%s4040_s16] ss:$0 sm:$0xff]  ;;  %s3366_s16 = smov [#allocation10]  }
0x18b5   :  { %v3050_v42 = vpop.f32.mrb[75].mxu1  ;;  %3128 = vrot.lane.b32.xlu1 %v3127_v40, %s3364_s28  ;;  %v3150_v40 = vld [vmem:[%s4041_s17 + $0x18] sm:$0xff]   ;;  %s2650_s17 = sshll.u32 %s3366_s16, 4  ;;  %s2651_s17 = int_to_ptr.vmem [resolvable:$true] %s2650_s17 }
0x18b6   :  { %s3315_s12 = scalar_lea.vmem %s2651_s17, 256  ;;  %p3320_p5 = scmp.lt.s32.totalorder %s2651_s17, %s2651_s17 }
0x18b7   :  { %p3316_p4 = scmp.ne.s32.totalorder %s2651_s17, %s3315_s12  ;;  %p3321_p6 = scmp.lt.s32.totalorder %s3315_s12, %s3315_s12 }
0x18b9   :  { %p3322_p7 = por %p3321_p6, %p3320_p5 }
0x18bb   :  { %p3323_p8 = pnand %p3322_p7, %p3316_p4 }
0x1927   :  { %v3129_v48 = vpop.permute.xlu1 %3128 }
0x1928   :  { %v3131_v51 = vunpack.i.h.bf16 %v3129_v48  ;;  %v3130_v52 = vunpack.i.l.bf16 %v3129_v48 }
0x192a   :  { %v2374_v55 = vsel %vm1156_vm5, %v2372_v54, %v3131_v51  ;;  %v2373_v56 = vsel %vm1156_vm5, %v2371_v53, %v3130_v52 }
0x192b   :  { %v2375_v57 = vpack.c.bf16 %v2374_v55, %v2373_v56 }
0x192d   :  { %3056 = vmatmul.mubr.msk.bf16.vlgmr.msra.gmra.mrb[68].mxu0 %vm133_vm0, %v2375_v57 }
0x192e   :  { %3075 = vmatprep.mubr.msk.bf16.mxu0 %vm3350_vm1, %v3349_v15  ;;  %3068 = vmatpush3.bf16.msra.mxu0 %v3147_v59 }
0x192f   :  { %3069 = vmatprep.subr.bf16.mxu0 %v3349_v15 }
0x1932   :  { %3070 = vmatpush3.bf16.msra.mxu0 %v3148_v63 }
0x1933   :  { %3071 = vmatprep.subr.bf16.mxu0 %v3349_v15 }
0x1936   :  { %3072 = vmatpush3.bf16.msra.mxu0 %v3149_v39 }
0x1937   :  { %3073 = vmatprep.subr.bf16.mxu0 %v3349_v15 }
0x193a   :  { %3074 = vmatpush3.bf16.msra.mxu0 %v3150_v40 }
0x1a00   :  { %v2431_v17 = vpop.f32.mrb[68].mxu0 }
0x1a01   :  { %v2432_v58 = vadd.f32 %v2719_v9, %v2431_v17  ;;  %v3057_v60 = vpop.f32.mrb[69].mxu0 }
0x1a02   :  { %v2434_v61 = vpop.f32.mrb[70].mxu0 }
0x1a03   :  { %v3965_v62 = vadd.f32 %v2432_v58, %v3731_v10  ;;  %v2435_v3 = vadd.f32 %v2719_v9, %v2434_v61  ;;  %v3058_v24 = vpop.f32.mrb[71].mxu0 }
0x1a05   :  { %v3968_v6 = vadd.f32 %v2435_v3, %v3734_v16  ;;  %v2442_v8 = vsel %vm133_vm0, %v3965_v62, 0.0 }
0x1a06   :  { %2443 = vadd.xlane.f32.xlu0 %v2442_v8 }
0x1a07   :  { %v2445_v21 = vsel %vm133_vm0, %v3968_v6, 0.0 }
0x1a08   :  { %2446 = vadd.xlane.f32.xlu1 %v2445_v21 }
0x1a93   :  { %v2444_v13 = vpop.xlane.xlu0 %2443 }
0x1a94   :  { %v2448_v14 = vmul.f32 0.03125, %v2444_v13 }
0x1a95   :  { %v2447_v18 = vpop.xlane.xlu1 %2446 }
0x1a96   :  { %v2450_v19 = vsub.f32 %v3965_v62, %v2448_v14  ;;  %v2449_v10 = vmul.f32 0.03125, %v2447_v18 }
0x1a98   :  { %v2451_v0 = vsub.f32 %v3968_v6, %v2449_v10  ;;  %v2452_v1 = vmul.f32 %v2450_v19, %v2450_v19 }
0x1a9a   :  { %v2454_v16 = vsel %vm133_vm0, %v2452_v1, 0.0  ;;  %v2453_v20 = vmul.f32 %v2451_v0, %v2451_v0 }
0x1a9b   :  { %2455 = vadd.xlane.f32.xlu0 %v2454_v16 }
0x1a9c   :  { %v2457_v22 = vsel %vm133_vm0, %v2453_v20, 0.0 }
0x1a9f   :  { %2458 = vadd.xlane.f32.xlu0 %v2457_v22 }
0x1b28   :  { %v2456_v2 = vpop.xlane.xlu0 %2455 }
0x1b29   :  { %v2460_v25 = vmul.f32 0.03125, %v2456_v2 }
0x1b2b   :  { %v2462_v26 = vadd.f32 1e-05, %v2460_v25 }
0x1b2c   :  { %v2459_v27 = vpop.xlane.xlu0 %2458 }
0x1b2d   :  { %3223 = vrsqrt.f32 %v2462_v26  ;;  %v2461_v28 = vmul.f32 0.03125, %v2459_v27 }
0x1b2f   :  { %v2463_v38 = vadd.f32 1e-05, %v2461_v28 }
0x1b31   :  { %3225 = vrsqrt.f32 %v2463_v38 }
0x1b37   :  { %v3224_v7 = vpop.eup %3223 }
0x1b38   :  { %v2466_v11 = vmul.f32 %v3224_v7, %v2450_v19 }
0x1b3a   :  { %v2474_v5 = vmul.f32 %v2723_v30, %v2466_v11 }
0x1b3b   :  { %v3226_v31 = vpop.eup %3225 }
0x1b3c   :  { %v2467_v32 = vmul.f32 %v3226_v31, %v2451_v0  ;;  %v2482_v34 = vadd.f32 %v2724_v29, %v2474_v5 }
0x1b3e   :  { %v2475_v33 = vmul.f32 %v2723_v30, %v2467_v32 }
0x1b40   :  { %v2483_v36 = vadd.f32 %v2724_v29, %v2475_v33 }
0x1b42   :  { %v2484_v37 = vpack.c.bf16 %v2483_v36, %v2482_v34 }
0x1b44   :  { %3064 = vmatmul.mubr.msk.bf16.vlgmr.msra.gmra.mrb[76].mxu1 %vm133_vm0, %v2484_v37 }
0x1c17   :  { %v2545_v41 = vpop.f32.mrb[76].mxu1 }
0x1c18   :  { %v2546_v42 = vadd.f32 %v2725_v35, %v2545_v41  ;;  %v3065_v43 = vpop.f32.mrb[77].mxu1 }
0x1c19   :  { %v2548_v44 = vpop.f32.mrb[78].mxu1 }
0x1c1a   :  { %v2549_v12 = vadd.f32 %v2725_v35, %v2548_v44  ;;  %v3066_v45 = vpop.f32.mrb[79].mxu1  ;;  %v2552_v46 = vmax.f32 %v2546_v42, 0.0 }
0x1c1c   :  { %v2553_v47 = vmax.f32 %v2549_v12, 0.0 }
0x1c1e   :  { %v2554_v48 = vpack.c.bf16 %v2553_v47, %v2552_v46 }
0x1c20   :  { %3076 = vmatmul.mubr.msk.bf16.vlgmr.msra.gmra.mrb[72].mxu0 %vm2587_vm8, %v2554_v48 }
0x1cf3   :  { %v2625_v15 = vpop.f32.mrb[72].mxu0 }
0x1cf4   :  { %v2632_v50 = vadd.f32 %v2625_v15, %v3965_v62  ;;  %v3077_v51 = vpop.f32.mrb[73].mxu0 }
0x1cf5   :  { %v2628_v52 = vpop.f32.mrb[74].mxu0 }
0x1cf6   :  { %v2641_v53 = vadd.f32 %v2734_v49, %v2632_v50  ;;  %v2633_v54 = vadd.f32 %v2628_v52, %v3968_v6  ;;  %v3078_v55 = vpop.f32.mrb[75].mxu0 }
0x1cf8   :  { %2643 = vst.msk [vmem:[#allocation10] sm:$0xff] %vm133_vm0, %v2641_v53  ;;  %v2642_v56 = vadd.f32 %v2734_v49, %v2633_v54 }
0x1cfa   :  { %2644 = vst.msk [vmem:[#allocation10 + $0x8] sm:$0xff] %vm133_vm0, %v2642_v56 }
0x1cfb   :  { %3326 = shalt.err (!%p3323_p8)
}
0x1cfc   :  { %s3327_s22 = scalar_lea.hbm %s4043_s19, 256 }
0x1cfd   :  { %p3328_p9 = scmp.ne.s32.totalorder %s4043_s19, %s3327_s22  ;;  %p3331_p10 = scmp.lt.u32.totalorder %s3327_s22, %s4043_s19 }
0x1cff   :  { %p3333_p11 = pnand %p3331_p10, %p3328_p9 }
0x1d01   :  { %3336 = shalt.err (!%p3333_p11)
}
0x1d02   :  { %s3367_s6 = smov 128  }
0x1d03   :  { %2656 = dma.vmem_to_hbm [thread:$0]  %s2651_s17, 256, %s4043_s19, [#allocation4], %s3367_s6, %s3367_s6, %s3362_s29  }
0x1d04   :  { %3343 = dma.done.wait [#allocation4], 256  }
0x1d05   :  { %3344 = vsyncadd [#allocation4], 4294967040 }
0x1d06   :  { %2660 = vsyncpa [#allocation3], 1 }
0x1d07   :  { %2661 = vsyncpa [#allocation6], 1 }
0x1d08   :  { %2662 = vsyncpa [#allocation9], 1 }
0x1d09   :  { %2663 = vsyncpa [#allocation4], 1 }

</bundles_post_ra>
